<compile_context>
chip_gen: v7x
topology: tpu7x:2x2x1
jax: 0.10.0
libtpu: 0.0.40
codegen_flags: <defaults>
</compile_context>

<pallas_src>
import math
import functools

import jax
import jax.numpy as jnp
from jax.experimental import pallas as pl
from jax.experimental.pallas import tpu as pltpu

# Keep f32 matmuls exact so the Pallas kernel and the pure-JAX reference agree bit-closely.
jax.config.update("jax_default_matmul_precision", "highest")


# ----------------------------- Pallas kernel ------------------------------ #

def _layer_norm(x, gamma, beta, eps=1e-5):
    inv_n = 1.0 / x.shape[-1]                       # compile-time constant
    mean = jnp.sum(x, axis=-1, keepdims=True) * inv_n
    xc = x - mean
    var = jnp.sum(xc * xc, axis=-1, keepdims=True) * inv_n
    inv = jax.lax.rsqrt(var + eps)                  # EUP
    return xc * inv * gamma + beta


def encoder_layer_kernel(
    x_ref,
    wqkv_ref, bqkv_ref,     # fused QKV projection
    wo_ref,
    w1_ref, b1_ref, w2_ref,
    ph_ref,                 # packed (6, H): [b_o, b_2, ln1_g, ln1_b, ln2_g, ln2_b]
    o_ref,
    *, num_heads, head_size,
):
    # Leading batch dim is squeezed by the BlockSpec: x is (S, H).
    x = x_ref[...]
    S = x.shape[0]
    A = num_heads * head_size

    # --- Multi-head self attention ------------------------------------------
    # Fused QKV projection: a single MXU pass with N = 3A.
    qkv = jnp.dot(x, wqkv_ref[...], preferred_element_type=jnp.float32) + bqkv_ref[...]
    q = qkv[:, :A] * (head_size ** -0.5)
    k = qkv[:, A:2 * A]
    v = qkv[:, 2 * A:]

    # Head-leading layout, all heads batched in one einsum pair (flash-style pattern).
    qh = q.reshape(S, num_heads, head_size).transpose(1, 0, 2)   # (n, S, d)
    kh = k.reshape(S, num_heads, head_size).transpose(1, 0, 2)   # (n, S, d)
    vh = v.reshape(S, num_heads, head_size).transpose(1, 0, 2)   # (n, S, d)

    logits = jnp.einsum("nqd,nkd->nqk", qh, kh,
                        preferred_element_type=jnp.float32)       # (n, S, S)
    m = jnp.max(logits, axis=-1, keepdims=True)
    e = jnp.exp(logits - m)
    w = e / jnp.sum(e, axis=-1, keepdims=True)                    # exact softmax divide
    ctx = jnp.einsum("nqk,nkd->nqd", w, vh,
                     preferred_element_type=jnp.float32)          # (n, S, d)
    attn = ctx.transpose(1, 0, 2).reshape(S, A)                   # (S, A)

    # Packed per-feature parameter rows (static sublane slices).
    bo = ph_ref[0:1, :]
    b2 = ph_ref[1:2, :]
    ln1_g = ph_ref[2:3, :]
    ln1_b = ph_ref[3:4, :]
    ln2_g = ph_ref[4:5, :]
    ln2_b = ph_ref[5:6, :]

    y = jnp.dot(attn, wo_ref[...], preferred_element_type=jnp.float32) + bo

    # residual + LayerNorm (attention sublayer)
    h1 = _layer_norm(x + y, ln1_g, ln1_b)

    # --- Feed-forward ---------------------------------------------------------
    hidden = jnp.dot(h1, w1_ref[...], preferred_element_type=jnp.float32) + b1_ref[...]
    hidden = jnp.maximum(hidden, 0.0)
    ff = jnp.dot(hidden, w2_ref[...], preferred_element_type=jnp.float32) + b2

    # residual + LayerNorm (FFN sublayer)
    out = _layer_norm(h1 + ff, ln2_g, ln2_b)

    o_ref[...] = out.astype(o_ref.dtype)


def transformer_encoder_layer(x, params, *, num_heads, head_size):
    B, S, H = x.shape

    # Fuse Q/K/V weights and biases; pack the small per-feature vectors into one array.
    w_qkv = jnp.concatenate([params["wq"], params["wk"], params["wv"]], axis=1)  # (H, 3A)
    b_qkv = jnp.concatenate([params["bq"], params["bk"], params["bv"]], axis=1)  # (1, 3A)
    p_h = jnp.concatenate(
        [params["bo"], params["b2"],
         params["ln1_g"], params["ln1_b"],
         params["ln2_g"], params["ln2_b"]], axis=0)                              # (6, H)

    weights = [w_qkv, b_qkv, params["wo"], params["w1"], params["b1"], params["w2"], p_h]

    def full(arr):
        return pl.BlockSpec(arr.shape, lambda b, _nd=arr.ndim: (0,) * _nd)

    kernel = functools.partial(
        encoder_layer_kernel, num_heads=num_heads, head_size=head_size
    )

    # Leading batch dim squeezed (None) -> kernel sees (S, H) tiles.
    act_spec = pl.BlockSpec((None, S, H), lambda b: (b, 0, 0))

    return pl.pallas_call(
        kernel,
        out_shape=jax.ShapeDtypeStruct((B, S, H), x.dtype),
        grid_spec=pltpu.PrefetchScalarGridSpec(
            num_scalar_prefetch=0,
            grid=(B,),
            in_specs=[act_spec] + [full(w) for w in weights],
            out_specs=act_spec,
        ),
        compiler_params=pltpu.CompilerParams(
            dimension_semantics=("parallel",),
            vmem_limit_bytes=32 * 1024 * 1024,
        ),
    )(x, *weights)


# ----------------------------- Parameter init ----------------------------- #

def xavier_uniform(key, fan_in, fan_out, gain=1.0):
    # matches torch.nn.init.xavier_uniform_; returned as (in, out) i.e. W^T
    bound = gain * math.sqrt(6.0 / (fan_in + fan_out))
    return jax.random.uniform(
        key, (fan_in, fan_out), dtype=jnp.float32, minval=-bound, maxval=bound
    )


def init_params(key, hidden_size, head_size, num_heads, filter_size):
    A = num_heads * head_size
    keys = jax.random.split(key, 6)
    g = 2 ** (-0.5)
    params = {
        # attention projections (weights stored as [in, out])
        "wq": xavier_uniform(keys[0], hidden_size, A, gain=g),
        "bq": jnp.zeros((1, A), jnp.float32),
        "wk": xavier_uniform(keys[1], hidden_size, A, gain=g),
        "bk": jnp.zeros((1, A), jnp.float32),
        "wv": xavier_uniform(keys[2], hidden_size, A, gain=g),
        "bv": jnp.zeros((1, A), jnp.float32),
        "wo": xavier_uniform(keys[3], A, hidden_size),
        "bo": jnp.zeros((1, hidden_size), jnp.float32),
        # layer norm 1 (default nn.LayerNorm init)
        "ln1_g": jnp.ones((1, hidden_size), jnp.float32),
        "ln1_b": jnp.zeros((1, hidden_size), jnp.float32),
        # feed-forward
        "w1": xavier_uniform(keys[4], hidden_size, filter_size),
        "b1": jnp.zeros((1, filter_size), jnp.float32),
        "w2": xavier_uniform(keys[5], filter_size, hidden_size),
        "b2": jnp.zeros((1, hidden_size), jnp.float32),
        # layer norm 2
        "ln2_g": jnp.ones((1, hidden_size), jnp.float32),
        "ln2_b": jnp.zeros((1, hidden_size), jnp.float32),
    }
    return params


# ------------------------- Pure-JAX reference ------------------------------ #

def reference(x, p, num_heads, head_size):
    B, S, H = x.shape
    A = num_heads * head_size

    def ln(v, g, b, eps=1e-5):
        m = v.mean(-1, keepdims=True)
        var = ((v - m) ** 2).mean(-1, keepdims=True)
        return (v - m) / jnp.sqrt(var + eps) * g + b

    q = x @ p["wq"] + p["bq"]
    k = x @ p["wk"] + p["bk"]
    v = x @ p["wv"] + p["bv"]
    sh = lambda t: t.reshape(B, S, num_heads, head_size).transpose(0, 2, 1, 3)
    qh, kh, vh = sh(q) * head_size ** (-0.5), sh(k), sh(v)
    logits = jnp.einsum("bhqd,bhkd->bhqk", qh, kh)
    w = jax.nn.softmax(logits, axis=-1)
    y = jnp.einsum("bhqk,bhkd->bhqd", w, vh)
    y = y.transpose(0, 2, 1, 3).reshape(B, S, A)
    y = y @ p["wo"] + p["bo"]
    h1 = ln(x + y, p["ln1_g"], p["ln1_b"])
    ff = jnp.maximum(h1 @ p["w1"] + p["b1"], 0.0) @ p["w2"] + p["b2"]
    return ln(h1 + ff, p["ln2_g"], p["ln2_b"])


# --------------------------------- Main ------------------------------------ #

if __name__ == "__main__":
    hidden_size = 32
    head_size = 8
    num_heads = 4
    filter_size = 64
    batch, seq = 2, 8

    key = jax.random.PRNGKey(0)
    kx, kp = jax.random.split(key)
    x = jax.random.normal(kx, (batch, seq, hidden_size), dtype=jnp.float32)
    params = init_params(kp, hidden_size, head_size, num_heads, filter_size)

    out = transformer_encoder_layer(
        x, params, num_heads=num_heads, head_size=head_size
    )
    out = jax.block_until_ready(out)

    ref = reference(x, params, num_heads, head_size)
    assert out.shape == (batch, seq, hidden_size)
    assert jnp.allclose(out, ref, atol=1e-4, rtol=1e-4), "mismatch vs reference"

    print("KERNEL_OK")
</pallas_src>

<mosaic_0001>
module attributes {stable_mosaic.version = 11 : i64} {
  func.func @encoder_layer_kernel(%arg0: i32, %arg1: memref<1x8x32xf32, #tpu.memory_space<vmem>>, %arg2: memref<32x96xf32, #tpu.memory_space<vmem>>, %arg3: memref<1x96xf32, #tpu.memory_space<vmem>>, %arg4: memref<32x32xf32, #tpu.memory_space<vmem>>, %arg5: memref<32x64xf32, #tpu.memory_space<vmem>>, %arg6: memref<1x64xf32, #tpu.memory_space<vmem>>, %arg7: memref<64x32xf32, #tpu.memory_space<vmem>>, %arg8: memref<6x32xf32, #tpu.memory_space<vmem>>, %arg9: memref<1x8x32xf32, #tpu.memory_space<vmem>>) attributes {dimension_semantics = [#tpu.dimension_semantics<parallel>], iteration_bounds = array<i64: 2>, scalar_prefetch = 0 : i64, scratch_operands = 0 : i64, tpu.core_type = #tpu.core_type<tc>, window_params = [{transform_indices = @transform_0, window_bounds = array<i64: 1, 8, 32>}, {pipeline_mode = #tpu.pipeline_mode<synchronous>, transform_indices = @transform_1, window_bounds = array<i64: 32, 96>}, {pipeline_mode = #tpu.pipeline_mode<synchronous>, transform_indices = @transform_2, window_bounds = array<i64: 1, 96>}, {pipeline_mode = #tpu.pipeline_mode<synchronous>, transform_indices = @transform_3, window_bounds = array<i64: 32, 32>}, {pipeline_mode = #tpu.pipeline_mode<synchronous>, transform_indices = @transform_4, window_bounds = array<i64: 32, 64>}, {pipeline_mode = #tpu.pipeline_mode<synchronous>, transform_indices = @transform_5, window_bounds = array<i64: 1, 64>}, {pipeline_mode = #tpu.pipeline_mode<synchronous>, transform_indices = @transform_6, window_bounds = array<i64: 64, 32>}, {pipeline_mode = #tpu.pipeline_mode<synchronous>, transform_indices = @transform_7, window_bounds = array<i64: 6, 32>}, {transform_indices = @transform_8, window_bounds = array<i64: 1, 8, 32>}]} {
    %c0 = arith.constant 0 : index
    %c0_0 = arith.constant 0 : index
    %c0_1 = arith.constant 0 : index
    %0 = vector.load %arg1[%c0, %c0_0, %c0_1] : memref<1x8x32xf32, #tpu.memory_space<vmem>>, vector<1x8x32xf32>
    %1 = vector.shape_cast %0 : vector<1x8x32xf32> to vector<8x32xf32>
    %c0_2 = arith.constant 0 : index
    %c0_3 = arith.constant 0 : index
    %2 = vector.load %arg2[%c0_2, %c0_3] : memref<32x96xf32, #tpu.memory_space<vmem>>, vector<32x96xf32>
    %cst = arith.constant dense<0.000000e+00> : vector<8x96xf32>
    %3 = tpu.matmul %1, %2, %cst {dimension_numbers = #tpu.dot_dimension_numbers<[1], [0], [0], [1], [0, 0, 1, 1], [], []>, precision = #tpu.contract_precision<fp32>} : vector<8x32xf32>, vector<32x96xf32>, vector<8x96xf32> -> vector<8x96xf32>
    %c0_4 = arith.constant 0 : index
    %c0_5 = arith.constant 0 : index
    %4 = vector.load %arg3[%c0_4, %c0_5] : memref<1x96xf32, #tpu.memory_space<vmem>>, vector<1x96xf32>
    %5 = vector.broadcast %4 : vector<1x96xf32> to vector<8x96xf32>
    %6 = arith.addf %3, %5 : vector<8x96xf32>
    %7 = vector.extract_strided_slice %6 {offsets = [0, 0], sizes = [8, 32], strides = [1, 1]} : vector<8x96xf32> to vector<8x32xf32>
    %cst_6 = arith.constant 0.353553385 : f32
    %8 = vector.broadcast %cst_6 : f32 to vector<8x32xf32>
    %9 = arith.mulf %7, %8 : vector<8x32xf32>
    %10 = vector.extract_strided_slice %6 {offsets = [0, 32], sizes = [8, 32], strides = [1, 1]} : vector<8x96xf32> to vector<8x32xf32>
    %11 = vector.extract_strided_slice %6 {offsets = [0, 64], sizes = [8, 32], strides = [1, 1]} : vector<8x96xf32> to vector<8x32xf32>
    %12 = vector.shape_cast %9 : vector<8x32xf32> to vector<8x4x8xf32>
    %13 = tpu.transpose %12, [1, 0, 2] : vector<8x4x8xf32> -> vector<4x8x8xf32>
    %14 = vector.shape_cast %10 : vector<8x32xf32> to vector<8x4x8xf32>
    %15 = tpu.transpose %14, [1, 0, 2] : vector<8x4x8xf32> -> vector<4x8x8xf32>
    %16 = vector.shape_cast %11 : vector<8x32xf32> to vector<8x4x8xf32>
    %17 = tpu.transpose %16, [1, 0, 2] : vector<8x4x8xf32> -> vector<4x8x8xf32>
    "tpu.trace_start"() <{level = 10 : i32, message = "nqd,nkd->nqk"}> : () -> ()
    %cst_7 = arith.constant dense<0.000000e+00> : vector<4x8x8xf32>
    %18 = tpu.matmul %13, %15, %cst_7 {dimension_numbers = #tpu.dot_dimension_numbers<[2], [2], [1], [1], [0, 0, 0, 1, 1, 1], [0], [0]>, precision = #tpu.contract_precision<fp32>} : vector<4x8x8xf32>, vector<4x8x8xf32>, vector<4x8x8xf32> -> vector<4x8x8xf32>
    "tpu.trace_stop"() : () -> ()
    %cst_8 = arith.constant dense<0xFF800000> : vector<4x8xf32>
    %19 = vector.multi_reduction <maximumf>, %18, %cst_8 [2] : vector<4x8x8xf32> to vector<4x8xf32>
    %20 = vector.shape_cast %19 : vector<4x8xf32> to vector<4x8x1xf32>
    %21 = vector.broadcast %20 : vector<4x8x1xf32> to vector<4x8x8xf32>
    %22 = arith.subf %18, %21 : vector<4x8x8xf32>
    %23 = math.exp %22 : vector<4x8x8xf32>
    %cst_9 = arith.constant dense<0.000000e+00> : vector<4x8xf32>
    %24 = vector.multi_reduction <add>, %23, %cst_9 [2] : vector<4x8x8xf32> to vector<4x8xf32>
    %25 = vector.shape_cast %24 : vector<4x8xf32> to vector<4x8x1xf32>
    %26 = vector.broadcast %25 : vector<4x8x1xf32> to vector<4x8x8xf32>
    %27 = arith.divf %23, %26 : vector<4x8x8xf32>
    "tpu.trace_start"() <{level = 10 : i32, message = "nqk,nkd->nqd"}> : () -> ()
    %cst_10 = arith.constant dense<0.000000e+00> : vector<4x8x8xf32>
    %28 = tpu.matmul %27, %17, %cst_10 {dimension_numbers = #tpu.dot_dimension_numbers<[2], [1], [1], [2], [0, 0, 0, 1, 1, 2], [0], [0]>, precision = #tpu.contract_precision<fp32>} : vector<4x8x8xf32>, vector<4x8x8xf32>, vector<4x8x8xf32> -> vector<4x8x8xf32>
    "tpu.trace_stop"() : () -> ()
    %29 = tpu.transpose %28, [1, 0, 2] : vector<4x8x8xf32> -> vector<8x4x8xf32>
    %30 = vector.shape_cast %29 : vector<8x4x8xf32> to vector<8x32xf32>
    %c0_11 = arith.constant 0 : index
    %c0_12 = arith.constant 0 : index
    %31 = vector.load %arg8[%c0_11, %c0_12] : memref<6x32xf32, #tpu.memory_space<vmem>>, vector<1x32xf32>
    %c1 = arith.constant 1 : index
    %c0_13 = arith.constant 0 : index
    %32 = vector.load %arg8[%c1, %c0_13] : memref<6x32xf32, #tpu.memory_space<vmem>>, vector<1x32xf32>
    %c2 = arith.constant 2 : index
    %c0_14 = arith.constant 0 : index
    %33 = vector.load %arg8[%c2, %c0_14] : memref<6x32xf32, #tpu.memory_space<vmem>>, vector<1x32xf32>
    %c3 = arith.constant 3 : index
    %c0_15 = arith.constant 0 : index
    %34 = vector.load %arg8[%c3, %c0_15] : memref<6x32xf32, #tpu.memory_space<vmem>>, vector<1x32xf32>
    %c4 = arith.constant 4 : index
    %c0_16 = arith.constant 0 : index
    %35 = vector.load %arg8[%c4, %c0_16] : memref<6x32xf32, #tpu.memory_space<vmem>>, vector<1x32xf32>
    %c5 = arith.constant 5 : index
    %c0_17 = arith.constant 0 : index
    %36 = vector.load %arg8[%c5, %c0_17] : memref<6x32xf32, #tpu.memory_space<vmem>>, vector<1x32xf32>
    %c0_18 = arith.constant 0 : index
    %c0_19 = arith.constant 0 : index
    %37 = vector.load %arg4[%c0_18, %c0_19] : memref<32x32xf32, #tpu.memory_space<vmem>>, vector<32x32xf32>
    %cst_20 = arith.constant dense<0.000000e+00> : vector<8x32xf32>
    %38 = tpu.matmul %30, %37, %cst_20 {dimension_numbers = #tpu.dot_dimension_numbers<[1], [0], [0], [1], [0, 0, 1, 1], [], []>, precision = #tpu.contract_precision<fp32>} : vector<8x32xf32>, vector<32x32xf32>, vector<8x32xf32> -> vector<8x32xf32>
    %39 = vector.broadcast %31 : vector<1x32xf32> to vector<8x32xf32>
    %40 = arith.addf %38, %39 : vector<8x32xf32>
    %41 = arith.addf %1, %40 : vector<8x32xf32>
    %cst_21 = arith.constant dense<0.000000e+00> : vector<8xf32>
    %42 = vector.multi_reduction <add>, %41, %cst_21 [1] : vector<8x32xf32> to vector<8xf32>
    %43 = vector.shape_cast %42 : vector<8xf32> to vector<8x1xf32>
    %cst_22 = arith.constant 3.125000e-02 : f32
    %44 = vector.broadcast %cst_22 : f32 to vector<8x1xf32>
    %45 = arith.mulf %43, %44 : vector<8x1xf32>
    %46 = vector.broadcast %45 : vector<8x1xf32> to vector<8x32xf32>
    %47 = arith.subf %41, %46 : vector<8x32xf32>
    %48 = arith.mulf %47, %47 : vector<8x32xf32>
    %cst_23 = arith.constant dense<0.000000e+00> : vector<8xf32>
    %49 = vector.multi_reduction <add>, %48, %cst_23 [1] : vector<8x32xf32> to vector<8xf32>
    %50 = vector.shape_cast %49 : vector<8xf32> to vector<8x1xf32>
    %cst_24 = arith.constant 3.125000e-02 : f32
    %51 = vector.broadcast %cst_24 : f32 to vector<8x1xf32>
    %52 = arith.mulf %50, %51 : vector<8x1xf32>
    %cst_25 = arith.constant 9.99999974E-6 : f32
    %53 = vector.broadcast %cst_25 : f32 to vector<8x1xf32>
    %54 = arith.addf %52, %53 : vector<8x1xf32>
    %55 = math.rsqrt %54 : vector<8x1xf32>
    %56 = vector.broadcast %55 : vector<8x1xf32> to vector<8x32xf32>
    %57 = arith.mulf %47, %56 : vector<8x32xf32>
    %58 = vector.broadcast %33 : vector<1x32xf32> to vector<8x32xf32>
    %59 = arith.mulf %57, %58 : vector<8x32xf32>
    %60 = vector.broadcast %34 : vector<1x32xf32> to vector<8x32xf32>
    %61 = arith.addf %59, %60 : vector<8x32xf32>
    %c0_26 = arith.constant 0 : index
    %c0_27 = arith.constant 0 : index
    %62 = vector.load %arg5[%c0_26, %c0_27] : memref<32x64xf32, #tpu.memory_space<vmem>>, vector<32x64xf32>
    %cst_28 = arith.constant dense<0.000000e+00> : vector<8x64xf32>
    %63 = tpu.matmul %61, %62, %cst_28 {dimension_numbers = #tpu.dot_dimension_numbers<[1], [0], [0], [1], [0, 0, 1, 1], [], []>, precision = #tpu.contract_precision<fp32>} : vector<8x32xf32>, vector<32x64xf32>, vector<8x64xf32> -> vector<8x64xf32>
    %c0_29 = arith.constant 0 : index
    %c0_30 = arith.constant 0 : index
    %64 = vector.load %arg6[%c0_29, %c0_30] : memref<1x64xf32, #tpu.memory_space<vmem>>, vector<1x64xf32>
    %65 = vector.broadcast %64 : vector<1x64xf32> to vector<8x64xf32>
    %66 = arith.addf %63, %65 : vector<8x64xf32>
    %cst_31 = arith.constant 0.000000e+00 : f32
    %67 = vector.broadcast %cst_31 : f32 to vector<8x64xf32>
    %68 = arith.maximumf %66, %67 : vector<8x64xf32>
    %c0_32 = arith.constant 0 : index
    %c0_33 = arith.constant 0 : index
    %69 = vector.load %arg7[%c0_32, %c0_33] : memref<64x32xf32, #tpu.memory_space<vmem>>, vector<64x32xf32>
    %cst_34 = arith.constant dense<0.000000e+00> : vector<8x32xf32>
    %70 = tpu.matmul %68, %69, %cst_34 {dimension_numbers = #tpu.dot_dimension_numbers<[1], [0], [0], [1], [0, 0, 1, 1], [], []>, precision = #tpu.contract_precision<fp32>} : vector<8x64xf32>, vector<64x32xf32>, vector<8x32xf32> -> vector<8x32xf32>
    %71 = vector.broadcast %32 : vector<1x32xf32> to vector<8x32xf32>
    %72 = arith.addf %70, %71 : vector<8x32xf32>
    %73 = arith.addf %61, %72 : vector<8x32xf32>
    %cst_35 = arith.constant dense<0.000000e+00> : vector<8xf32>
    %74 = vector.multi_reduction <add>, %73, %cst_35 [1] : vector<8x32xf32> to vector<8xf32>
    %75 = vector.shape_cast %74 : vector<8xf32> to vector<8x1xf32>
    %cst_36 = arith.constant 3.125000e-02 : f32
    %76 = vector.broadcast %cst_36 : f32 to vector<8x1xf32>
    %77 = arith.mulf %75, %76 : vector<8x1xf32>
    %78 = vector.broadcast %77 : vector<8x1xf32> to vector<8x32xf32>
    %79 = arith.subf %73, %78 : vector<8x32xf32>
    %80 = arith.mulf %79, %79 : vector<8x32xf32>
    %cst_37 = arith.constant dense<0.000000e+00> : vector<8xf32>
    %81 = vector.multi_reduction <add>, %80, %cst_37 [1] : vector<8x32xf32> to vector<8xf32>
    %82 = vector.shape_cast %81 : vector<8xf32> to vector<8x1xf32>
    %cst_38 = arith.constant 3.125000e-02 : f32
    %83 = vector.broadcast %cst_38 : f32 to vector<8x1xf32>
    %84 = arith.mulf %82, %83 : vector<8x1xf32>
    %cst_39 = arith.constant 9.99999974E-6 : f32
    %85 = vector.broadcast %cst_39 : f32 to vector<8x1xf32>
    %86 = arith.addf %84, %85 : vector<8x1xf32>
    %87 = math.rsqrt %86 : vector<8x1xf32>
    %88 = vector.broadcast %87 : vector<8x1xf32> to vector<8x32xf32>
    %89 = arith.mulf %79, %88 : vector<8x32xf32>
    %90 = vector.broadcast %35 : vector<1x32xf32> to vector<8x32xf32>
    %91 = arith.mulf %89, %90 : vector<8x32xf32>
    %92 = vector.broadcast %36 : vector<1x32xf32> to vector<8x32xf32>
    %93 = arith.addf %91, %92 : vector<8x32xf32>
    %c0_40 = arith.constant 0 : index
    %c0_41 = arith.constant 0 : index
    %c0_42 = arith.constant 0 : index
    %94 = vector.load %arg9[%c0_40, %c0_41, %c0_42] : memref<1x8x32xf32, #tpu.memory_space<vmem>>, vector<1x8x32xf32>
    %95 = vector.shape_cast %94 : vector<1x8x32xf32> to vector<8x32xf32>
    %96 = vector.shape_cast %93 : vector<8x32xf32> to vector<1x8x32xf32>
    tpu.vector_store %arg9[%c0_40, %c0_41, %c0_42], %96 {strides = array<i32>} : memref<1x8x32xf32, #tpu.memory_space<vmem>>, vector<1x8x32xf32>,
    return
  }
  func.func @transform_0(%arg0: i32) -> (i32, i32, i32) {
    %c0_i32 = arith.constant 0 : i32
    %c0_i32_0 = arith.constant 0 : i32
    %c0_i32_1 = arith.constant 0 : i32
    return %arg0, %c0_i32, %c0_i32_0 : i32, i32, i32
  }
  func.func @transform_1(%arg0: i32) -> (i32, i32) {
    %c0_i32 = arith.constant 0 : i32
    %c0_i32_0 = arith.constant 0 : i32
    %c0_i32_1 = arith.constant 0 : i32
    return %c0_i32, %c0_i32_0 : i32, i32
  }
  func.func @transform_2(%arg0: i32) -> (i32, i32) {
    %c0_i32 = arith.constant 0 : i32
    %c0_i32_0 = arith.constant 0 : i32
    %c0_i32_1 = arith.constant 0 : i32
    return %c0_i32, %c0_i32_0 : i32, i32
  }
  func.func @transform_3(%arg0: i32) -> (i32, i32) {
    %c0_i32 = arith.constant 0 : i32
    %c0_i32_0 = arith.constant 0 : i32
    %c0_i32_1 = arith.constant 0 : i32
    return %c0_i32, %c0_i32_0 : i32, i32
  }
  func.func @transform_4(%arg0: i32) -> (i32, i32) {
    %c0_i32 = arith.constant 0 : i32
    %c0_i32_0 = arith.constant 0 : i32
    %c0_i32_1 = arith.constant 0 : i32
    return %c0_i32, %c0_i32_0 : i32, i32
  }
  func.func @transform_5(%arg0: i32) -> (i32, i32) {
    %c0_i32 = arith.constant 0 : i32
    %c0_i32_0 = arith.constant 0 : i32
    %c0_i32_1 = arith.constant 0 : i32
    return %c0_i32, %c0_i32_0 : i32, i32
  }
  func.func @transform_6(%arg0: i32) -> (i32, i32) {
    %c0_i32 = arith.constant 0 : i32
    %c0_i32_0 = arith.constant 0 : i32
    %c0_i32_1 = arith.constant 0 : i32
    return %c0_i32, %c0_i32_0 : i32, i32
  }
  func.func @transform_7(%arg0: i32) -> (i32, i32) {
    %c0_i32 = arith.constant 0 : i32
    %c0_i32_0 = arith.constant 0 : i32
    %c0_i32_1 = arith.constant 0 : i32
    return %c0_i32, %c0_i32_0 : i32, i32
  }
  func.func @transform_8(%arg0: i32) -> (i32, i32, i32) {
    %c0_i32 = arith.constant 0 : i32
    %c0_i32_0 = arith.constant 0 : i32
    %c0_i32_1 = arith.constant 0 : i32
    return %arg0, %c0_i32, %c0_i32_0 : i32, i32, i32
  }
}

</mosaic_0001>

<bundles_post_ra>
// kernel: tpu_custom_call.1
= control target key start
LH: loop header
LB: loop body
LE: loop exit
PB: predicated region body
PF: predicated region fallthrough
CT: control target
= control target key end

     0   :  { %13 = vsyncpa [#allocation3], 0  ;;  %s8932_s0 = inlined_call_operand.hbm [shape: f32[2,8,32], index: 0, kind: input, shape index: {}]   ;;  %s8933_s1 = inlined_call_operand.vmem [shape: f32[32,96], index: 1, kind: input, shape index: {}]   ;;  %s8934_s2 = inlined_call_operand.vmem [shape: f32[1,96], index: 2, kind: input, shape index: {}]   ;;  %s8935_s3 = inlined_call_operand.vmem [shape: f32[32,32], index: 3, kind: input, shape index: {}]   ;;  %s8936_s4 = inlined_call_operand.vmem [shape: f32[32,64], index: 4, kind: input, shape index: {}]   ;;  %s8937_s5 = inlined_call_operand.vmem [shape: f32[1,64], index: 5, kind: input, shape index: {}]   ;;  %s8938_s6 = inlined_call_operand.vmem [shape: f32[64,32], index: 6, kind: input, shape index: {}]   ;;  %s8939_s7 = inlined_call_operand.vmem [shape: f32[6,32], index: 7, kind: input, shape index: {}]   ;;  %s8940_s8 = inlined_call_operand.hbm [shape: f32[2,8,32], index: 8, kind: output, shape index: {}]  }
   0x1   :  { %15 = vsyncpa [#allocation3 + $0x1], 0 }
   0x2   :  { %16 = vsyncpa [#allocation4], 0 }
   0x3   :  { %18 = vsyncpa [#allocation4 + $0x1], 0  ;;  %s8101_s27 = smov 0   ;;  %s8103_s28 = smov 0  }
   0x4   :  { %s8105_s29 = smov 0   ;;  %s8107_s30 = smov 0  }
   0x5 LB: > { %s8122_s9 = sadd.s32 4294967295, %s8039_s30   ;;  %s6762_s10 = sadd.s32 4294967294, %s8039_s30   ;;  %s8039_s30 = sphi %s8107_s30, %s8955_s30   ;;  %s8035_s29 = sphi %s8105_s29, %s8954_s29   ;;  %s8031_s28 = sphi %s8103_s28, %s8953_s28   ;;  %s8027_s27 = sphi %s8101_s27, %s8952_s27  }
   0x6   : > { %s8126_s11 = sadd.s32 1, %s8039_s30   ;;  %s31_s12 = sadd.s32 1, %s8035_s29 }
   0x7   : > { %s28_s13 = ssub.s32 %s8039_s30, %s8126_s11  ;;  %p38_p0 = scmp.ne.s32.totalorder %s8035_s29, %s8031_s28 }
   0x8   : > { %p29_p1 = scmp.eq.s32.totalorder %s28_s13, 0  ;;  %p39_p2 = scmp.eq.s32.totalorder %s8039_s30, 0 }
   0x9   : > { %p44_p3 = scmp.ne.s32.totalorder %s8031_s28, %s8027_s27  ;;  %p45_p4 = scmp.eq.s32.totalorder %s8122_s9, 0 }
   0xa   : > { %s8138_s14 = scalar_select %p29_p1, %s8035_s29, %s31_s12  }
   0xb   : > { %p8140_p5 = por %p39_p2, %p38_p0  ;;  %p8144_p6 = por %p45_p4, %p44_p3 }
   0xc   : > { %p215_p7 = scmp.eq.s32.totalorder %s8122_s9, 1  ;;  %p221_p8 = scmp.eq.s32.totalorder %s6762_s10, 1 }
   0xd   : > { %p7875_p10 = scmp.lt.s32.totalorder %s8039_s30, 2  ;;  %s262_s19 = sand.u32 1, %s8035_s29  }
   0xe   : > { %p8151_p11 = por %p215_p7, %p38_p0  ;;  %p8155_p12 = por %p221_p8, %p44_p3 }
   0xf   : > { %s6766_s20 = sshll.u32 %s8039_s30, 7  ;;  %s6765_s21 = sshll.u32 %s262_s19, 3 }
  0x10   : > { %s8944_s17 = scalar_select %p8151_p11, 1, 0 }
  0x11   : > { %s8945_s18 = scalar_select %p8155_p12, 1, 0 }
  0x12   : > { %s8164_s24 = scalar_lea.hbm %s8932_s0, %s6766_s20  ;;  %s266_s25 = scalar_lea.vmem [#allocation2], %s6765_s21 }
  0x13   : > { %s273_s26 = sshll.u32 %s266_s25, 4  ;;  %p8168_p13 = pnand %p7875_p10, %p8140_p5  ;;  %s8172_s26 = int_to_ptr.vmem [resolvable:$true] %s273_s26 }
  0x14   : > { %s263_s12 = scalar_lea.sflag [#allocation3], %s262_s19  ;;  %s7943_s13 = scalar_lea.hbm %s8164_s24, 128 }
  0x15   : > { %p7944_p2 = scmp.ne.s32.totalorder %s8164_s24, %s7943_s13  ;;  %p7945_p3 = pneg %p8168_p13 }
  0x16   : > { %s7948_s21 = scalar_lea.hbm %s8932_s0, 256  ;;  %p7949_p5 = scmp.lt.u32.totalorder %s8164_s24, %s8932_s0 }
  0x17   : > { %p7946_p4 = pnand %p7945_p3, %p7944_p2  ;;  %p7950_p8 = scmp.lt.u32.totalorder %s7948_s21, %s7943_s13 }
  0x18   : > { %p7952_p9 = scmp.lt.u32.totalorder %s7943_s13, %s8164_s24 }
  0x19   : > { %p7947_p7 = pneg %p7946_p4  ;;  %p7951_p10 = por %p7950_p8, %p7949_p5 }
  0x1b   : > { %p7953_p0 = por %p7952_p9, %p7951_p10 }
  0x1d   : > { %p7954_p1 = pnand %p7953_p0, %p7947_p7 }
  0x1f   : > { %7957 = shalt.err (!%p7954_p1)
}
  0x20   : > { %s7958_s19 = scalar_lea.vmem %s8172_s26, 128  ;;  %s8041_s25 = smov [#allocation2]  }
  0x21   : > { %p7959_p2 = scmp.ne.s32.totalorder %s8172_s26, %s7958_s19  ;;  %s7963_s15 = sshll.u32 %s8041_s25, 4  ;;  %s7964_s15 = int_to_ptr.vmem [resolvable:$false] %s7963_s15 }
  0x22   : > { %s7965_s20 = scalar_lea.vmem %s7964_s15, 256  ;;  %p7966_p11 = scmp.lt.s32.totalorder %s8172_s26, %s7964_s15 }
  0x23   : > { %p7961_p4 = pnand %p7959_p2, %p7945_p3  ;;  %p7967_p5 = scmp.lt.s32.totalorder %s7965_s20, %s7958_s19 }
  0x25   : > { %p7962_p12 = pneg %p7961_p4  ;;  %p7968_p8 = por %p7967_p5, %p7966_p11 }
  0x27   : > { %p7969_p9 = pnand %p7968_p8, %p7962_p12 }
  0x29   : > { %7972 = shalt.err (!%p7969_p9)
}
  0x2a   : > { %7870 = dma.hbm_to_vmem [thread:$0]  (!%p8168_p13), %s8164_s24, 128, %s8172_s26, %s263_s12  }
  0x2b   : > { %p8947_p0 = scmp.lt.s32.totalorder %s8039_s30, 3  ;;  %p8948_p1 = scmp.ge.s32.totalorder %s8039_s30, 1 }
  0x2d   : > { %p279_p3 = pnand %p8948_p1, %p8947_p0 }
  0x2e   : > { %s8206_s13 = sand.u32 (!%p279_p3), 1, %s8031_s28  }
  0x2f   : > { %282 = sbr.rel (%p279_p3) target bundleno = 3073 (0xc01), region = 52  ;;  %s6768_s21 = sshll.u32 (!%p279_p3), %s8206_s13, 3 }
  0x30   : > { %s285_s22 = scalar_lea.sflag (!%p279_p3), [#allocation3], %s8206_s13  ;;  %s8212_s10 = scalar_lea.vmem (!%p279_p3), [#allocation2], %s6768_s21 }
  0x36   : > { %8018 = dma.done.wait (%p8144_p6), %s285_s22, 128  }
  0x37   : > { %8020 = vsyncadd (%p8144_p6), %s285_s22, 4294967168  ;;  %v8042_v0 = vmov 0.0|0.0   ;;  %vm8043_vm0 = vmmov 0   ;;  %v8044_v1 = vmov 0.0   ;;  %vm333_vm1 = vcmask 261120   ;;  %v322_v2 = vld [vmem:[%s8933_s1] sm:$0xff] }
  0x38   : > { %7588 = vmatprep.subr.bf16.mxu0 %v8042_v0  ;;  %7049 = vmatprep.mubr.msk.f32.mxu0 %vm8043_vm0, %v8044_v1  ;;  %v323_v3 = vld [vmem:[%s8933_s1 + $0x8] sm:$0xff]  ;;  %v324_v4 = vld [vmem:[%s8933_s1 + $0x10] sm:$0xff]  ;;  %v338_v5 = vand.u32 4294901760, %v322_v2  ;;  %v325_v7 = vld [vmem:[%s8933_s1 + $0x18] sm:$0xff]  ;;  %s8045_s24 = smov 104   ;;  %s8046_s26 = smov 120   ;;  %v838_v51 = vlaneseq }
  0x39   : > { %7582 = vmatprep.subr.bf16.mxu1 %v8042_v0  ;;  %7038 = vmatprep.mubr.msk.f32.mxu1 %vm8043_vm0, %v8044_v1  ;;  %v341_v6 = vand.u32 4294901760, %v323_v3  ;;  %v344_v8 = vand.u32 4294901760, %v324_v4  ;;  %v321_v9 = vld [vmem:[%s8212_s10] sm:$0xff]  ;;  %v347_v10 = vand.u32 4294901760, %v325_v7  ;;  %s8047_s16 = smov 112   ;;  %s8048_s12 = smov 96  }
  0x3a   : > { %v335_v11 = vsel %vm333_vm1, %v321_v9, 0  ;;  %v418_v12 = vsub.f32 %v322_v2, %v338_v5  ;;  %v6770_v43 = vld [vmem:[%s8934_s2] ss:$0 sm:$0xff]  ;;  %v8049_v49 = vmov 1983009808   ;;  %v839_v57 = vshrl.u32 %v838_v51, 7 }
  0x3b   : > { %v425_v13 = vsub.f32 %v323_v3, %v341_v6  ;;  %v432_v14 = vsub.f32 %v324_v4, %v344_v8  ;;  %v439_v15 = vsub.f32 %v325_v7, %v347_v10  ;;  %v406_v16 = vand.u32 4294901760, %v335_v11  ;;  %s8051_s23 = smov 64   ;;  %s8054_s19 = smov 24  }
  0x3c   : > { %v7583_v17 = vpack.c.bf16 %v341_v6, %v338_v5  ;;  %v419_v18 = vand.u32 4294901760, %v418_v12  ;;  %v7586_v27 = vpack.c.bf16 %v347_v10, %v344_v8  ;;  %v836_v50 = vunpack.c.l.s4 %v8049_v49  ;;  %s6679_s25 = scalar_lea.sflag [#allocation4], %s8206_s13  ;;  %p8949_p11 = scmp.ne.s32.totalorder %s8944_s17, 0 }
  0x3d   : > { %v426_v19 = vand.u32 4294901760, %v425_v13  ;;  %v433_v20 = vand.u32 4294901760, %v432_v14  ;;  %v440_v21 = vand.u32 4294901760, %v439_v15  ;;  %v407_v22 = vsub.f32 %v335_v11, %v406_v16 }
  0x3e   : > { %7584 = vmatpush3.bf16.msra.mxu1 %v7583_v17  ;;  %v420_v23 = vsub.f32 %v418_v12, %v419_v18  ;;  %v7595_v37 = vpack.c.bf16 %v425_v13, %v418_v12  ;;  %v7598_v38 = vpack.c.bf16 %v439_v15, %v432_v14  ;;  %v8050_v54 = vmov 1934713408  }
  0x3f   : > { %v427_v24 = vsub.f32 %v425_v13, %v426_v19  ;;  %v434_v25 = vsub.f32 %v432_v14, %v433_v20  ;;  %7585 = vmatprep.subr.bf16.mxu1 %v8042_v0  ;;  %v441_v26 = vsub.f32 %v439_v15, %v440_v21  ;;  %v408_v28 = vand.u32 4294901760, %v407_v22 }
  0x40   : > { %v421_v29 = vand.u32 4294901760, %v420_v23  ;;  %v7607_v39 = vpack.c.bf16 %v426_v19, %v419_v18  ;;  %v7610_v40 = vpack.c.bf16 %v440_v21, %v433_v20  ;;  %v868_v55 = vunpack.c.l.s4 %v8050_v54 }
  0x41   : > { %v428_v30 = vand.u32 4294901760, %v427_v24  ;;  %v435_v31 = vand.u32 4294901760, %v434_v25  ;;  %v442_v32 = vand.u32 4294901760, %v441_v26  ;;  %v409_v33 = vsub.f32 %v407_v22, %v408_v28 }
  0x42   : > { %7587 = vmatpush3.bf16.msra.mxu1 %v7586_v27  ;;  %v837_v56 = vunpack.c.0.s8 %v836_v50  ;;  %v869_v60 = vunpack.c.0.s8 %v868_v55  ;;  %vm1272_vm2 = vcmask 64512   ;;  %vm5070_vm3 = vcmask 130048  }
  0x43   : > { %v7589_v34 = vpack.c.bf16 %v428_v30, %v421_v29  ;;  %7096 = vmatprep.subr.mxu1 %v8044_v1  ;;  %v410_v35 = vand.u32 4294901760, %v409_v33  ;;  %v7592_v36 = vpack.c.bf16 %v442_v32, %v435_v31  ;;  %vm5072_vm4 = vcmask 195584  }
  0x44   : > { %v8281_v61 = vsub.s32 %v837_v56, %v839_v57  ;;  %v8283_v6 = vsub.s32 %v869_v60, %v839_v57  ;;  %vm6112_vm5 = vcmask 523264  }
  0x45   : > { %7590 = vmatpush3.bf16.msra.mxu0 %v7589_v34  ;;  %7039 = vmatmul.mubr.f32.vlgmr.msra.gmra.mrb[0].mxu1 %v410_v35 }
  0x46   : > { %7591 = vmatprep.subr.bf16.mxu0 %v8042_v0  ;;  %7098 = vmatprep.mubr.msk.f32.mxu1 %vm8043_vm0, %v8044_v1 }
  0x49   : > { %7593 = vmatpush3.bf16.msra.mxu0 %v7592_v36 }
  0x4a   : > { %7594 = vmatprep.subr.bf16.mxu0 %v8042_v0 }
  0x4c   : > { %7050 = vmatmul.mubr.f32.vlgmr.msra.gmra.mrb[0].mxu0 %v406_v16 }
  0x4d   : > { %7596 = vmatpush3.bf16.msra.mxu0 %v7595_v37  ;;  %7060 = vmatprep.mubr.msk.f32.mxu0 %vm8043_vm0, %v8044_v1 }
  0x4e   : > { %7597 = vmatprep.subr.bf16.mxu0 %v8042_v0 }
  0x51   : > { %7599 = vmatpush3.bf16.msra.mxu0 %v7598_v38 }
  0x52   : > { %7600 = vmatprep.subr.bf16.mxu0 %v8042_v0 }
  0x54   : > { %7061 = vmatmul.mubr.f32.vlgmr.msra.gmra.mrb[0].mxu0 %v407_v22 }
  0x55   : > { %7602 = vmatpush3.bf16.msra.mxu0 %v7583_v17  ;;  %7071 = vmatprep.mubr.msk.f32.mxu0 %vm8043_vm0, %v8044_v1 }
  0x56   : > { %7603 = vmatprep.subr.bf16.mxu0 %v8042_v0 }
  0x59   : > { %7605 = vmatpush3.bf16.msra.mxu0 %v7586_v27 }
  0x5a   : > { %7606 = vmatprep.subr.bf16.mxu0 %v8042_v0 }
  0x5c   : > { %7072 = vmatmul.mubr.f32.vlgmr.msra.gmra.mrb[0].mxu0 %v408_v28 }
  0x5d   : > { %7608 = vmatpush3.bf16.msra.mxu0 %v7607_v39  ;;  %7082 = vmatprep.mubr.msk.f32.mxu0 %vm8043_vm0, %v8044_v1 }
  0x5e   : > { %7609 = vmatprep.subr.bf16.mxu0 %v8042_v0 }
  0x61   : > { %7611 = vmatpush3.bf16.msra.mxu0 %v7610_v40 }
  0x62   : > { %7612 = vmatprep.subr.bf16.mxu0 %v8042_v0 }
  0x64   : > { %7083 = vmatmul.mubr.f32.vlgmr.msra.gmra.mrb[0].mxu0 %v406_v16 }
  0x65   : > { %7614 = vmatpush3.bf16.msra.mxu0 %v7583_v17  ;;  %7093 = vmatprep.mubr.msk.f32.mxu0 %vm8043_vm0, %v8044_v1 }
  0x66   : > { %7615 = vmatprep.subr.bf16.mxu0 %v8042_v0 }
  0x69   : > { %7617 = vmatpush3.bf16.msra.mxu0 %v7586_v27 }
  0x6a   : > { %7156 = vmatprep.subr.mxu0 %v8044_v1 }
  0x6c   : > { %7094 = vmatmul.mubr.f32.vlgmr.msra.gmra.mrb[0].mxu0 %v406_v16 }
  0x6d   : > { %7158 = vmatprep.mubr.msk.f32.mxu0 %vm8043_vm0, %v8044_v1 }
 0x118   : > { %v412_v41 = vpop.f32.mrb[0].mxu1 }
 0x119   : > { %v7040_v42 = vpop.f32.mrb[1].mxu1  ;;  %v413_v44 = vadd.f32 %v6770_v43, %v412_v41 }
 0x13f   : > { %v818_v45 = vpop.f32.mrb[0].mxu0 }
 0x140   : > { %v8265_v46 = vadd.f32 %v818_v45, %v413_v44  ;;  %v7095_v47 = vpop.f32.mrb[1].mxu0 }
 0x142   : > { %974 = vrot.lane.b32.xlu1 %v8265_v46, %s8045_s24  ;;  %970 = vrot.lane.b32.xlu0 %v8265_v46, %s8046_s26  ;;  %v822_v48 = vmul.f32 0.35355338, %v8265_v46 }
 0x146   : > { %972 = vrot.lane.b32.xlu0 %v8265_v46, %s8047_s16  ;;  %824 = vrot.lane.b32.xlu1 %v822_v48, %s8046_s26  ;;  %s6787_s26 = sshll.u32 %s8122_s9, 7  ;;  %s8055_s9 = smov [#allocation5]  }
 0x14a   : > { %827 = vrot.lane.b32.xlu0 %v822_v48, %s8047_s16  ;;  %830 = vrot.lane.b32.xlu1 %v822_v48, %s8045_s24 }
 0x14e   : > { %976 = vrot.lane.b32.xlu0 %v8265_v46, %s8048_s12 }
 0x1b4   : > { %v8272_v52 = vpop.permute.xlu1 %974  ;;  %v8274_v53 = vpop.permute.xlu0 %970 }
 0x1b5   : > { %978 = vrot.lane.b32.xlu1 %v8274_v53, %s8048_s12 }
 0x1b8   : > { %v8277_v58 = vpop.permute.xlu0 %972  ;;  %v825_v59 = vpop.permute.xlu1 %824 }
 0x1b9   : > { %980 = vrot.lane.b32.xlu0 %v8277_v58, %s8048_s12  ;;  %982 = vrot.lane.b32.xlu1 %v8272_v52, %s8048_s12  ;;  %s8052_s12 = smov 16  }
 0x1bc   : > { %v828_v62 = vpop.permute.xlu0 %827  ;;  %v831_v63 = vpop.permute.xlu1 %830 }
 0x1bd   : > { %v833_v2 = vcombine.low %v822_v48, %v828_v62  ;;  %v834_v3 = vcombine.high %v822_v48, %v828_v62  ;;  %v849_v4 = vcombine.low %v825_v59, %v831_v63  ;;  %v850_v5 = vcombine.high %v825_v59, %v831_v63 }
 0x1bf   : > { %v841_v7 = vrot.slane %v833_v2, %v8281_v61  ;;  %v848_v8 = vrot.slane %v834_v3, %v8281_v61  ;;  %v857_v9 = vrot.slane %v849_v4, %v8281_v61  ;;  %v864_v10 = vrot.slane %v850_v5, %v8281_v61 }
 0x1c0   : > { %v977_v36 = vpop.permute.xlu0 %976 }
 0x1c1   : > { %v865_v11 = vcombine.low %v841_v7, %v857_v9  ;;  %v866_v12 = vcombine.high %v841_v7, %v857_v9  ;;  %v881_v13 = vcombine.low %v848_v8, %v864_v10  ;;  %v882_v14 = vcombine.high %v848_v8, %v864_v10 }
 0x1c3   : > { %v873_v15 = vrot.slane %v865_v11, %v8283_v6  ;;  %v880_v16 = vrot.slane %v866_v12, %v8283_v6  ;;  %v889_v17 = vrot.slane %v881_v13, %v8283_v6  ;;  %v896_v18 = vrot.slane %v882_v14, %v8283_v6 }
 0x1c5   : > { %v901_v19 = vcombine.low %v873_v15, %v880_v16  ;;  %v6771_v20 = vcombine.high %v873_v15, %v880_v16  ;;  %v917_v21 = vcombine.low %v889_v17, %v896_v18  ;;  %v6772_v22 = vcombine.high %v889_v17, %v896_v18 }
 0x1c7   : > { %v908_v23 = vrot.slane %v901_v19, %v8281_v61  ;;  %v916_v24 = vrot.slane %v6771_v20, %v8281_v61  ;;  %v924_v25 = vrot.slane %v917_v21, %v8281_v61  ;;  %v932_v26 = vrot.slane %v6772_v22, %v8281_v61 }
 0x1c9   : > { %v934_v27 = vcombine.high %v908_v23, %v916_v24  ;;  %v950_v28 = vcombine.high %v924_v25, %v932_v26  ;;  %v933_v32 = vcombine.low %v908_v23, %v916_v24  ;;  %v949_v33 = vcombine.low %v924_v25, %v932_v26 }
 0x1cb   : > { %v8298_v29 = vrot.slane %v934_v27, %v8283_v6  ;;  %v8301_v30 = vrot.slane %v950_v28, %v8283_v6  ;;  %v8306_v34 = vrot.slane %v933_v32, %v8283_v6  ;;  %v8309_v35 = vrot.slane %v949_v33, %v8283_v6 }
 0x1cd   : > { %v968_v31 = vcombine.high %v8298_v29, %v8301_v30  ;;  %v965_v38 = vcombine.low %v8306_v34, %v8309_v35  ;;  %v967_v39 = vcombine.low %v8298_v29, %v8301_v30 }
 0x1cf   : > { %v1274_v47 = vsel %vm1272_vm2, %v965_v38, 0  ;;  %v2178_v48 = vsel %vm1272_vm2, %v967_v39, 0 }
 0x1d0   : > { %v8321_v60 = vand.u32 4294901760, %v1274_v47  ;;  %v8323_v62 = vand.u32 4294901760, %v2178_v48 }
 0x1d2   : > { %v8330_v10 = vsub.f32 %v1274_v47, %v8321_v60  ;;  %v8333_v11 = vsub.f32 %v2178_v48, %v8323_v62 }
 0x1d4   : > { %v1347_v20 = vand.u32 4294901760, %v8330_v10  ;;  %v2251_v21 = vand.u32 4294901760, %v8333_v11 }
 0x227   : > { %v979_v37 = vpop.permute.xlu1 %978 }
 0x22b   : > { %v981_v40 = vpop.permute.xlu0 %980  ;;  %v983_v41 = vpop.permute.xlu1 %982 }
 0x22c   : > { %v988_v42 = vcombine.low %v977_v36, %v981_v40  ;;  %v989_v43 = vcombine.high %v977_v36, %v981_v40  ;;  %v1004_v44 = vcombine.low %v979_v37, %v983_v41  ;;  %v1005_v45 = vcombine.high %v979_v37, %v983_v41 }
 0x22d   : > { %v1348_v36 = vsub.f32 %v8330_v10, %v1347_v20  ;;  %v2252_v37 = vsub.f32 %v8333_v11, %v2251_v21 }
 0x22e   : > { %v996_v49 = vrot.slane %v988_v42, %v8281_v61  ;;  %v1003_v50 = vrot.slane %v989_v43, %v8281_v61  ;;  %v1012_v51 = vrot.slane %v1004_v44, %v8281_v61  ;;  %v1019_v54 = vrot.slane %v1005_v45, %v8281_v61 }
 0x22f   : > { %v1349_v42 = vand.u32 4294901760, %v1348_v36  ;;  %v2253_v43 = vand.u32 4294901760, %v2252_v37 }
 0x230   : > { %v1020_v55 = vcombine.low %v996_v49, %v1012_v51  ;;  %v1021_v56 = vcombine.high %v996_v49, %v1012_v51  ;;  %v1036_v57 = vcombine.low %v1003_v50, %v1019_v54  ;;  %v1037_v59 = vcombine.high %v1003_v50, %v1019_v54 }
 0x231   : > { %v966_v51 = vcombine.high %v8306_v34, %v8309_v35 }
 0x232   : > { %v1028_v63 = vrot.slane %v1020_v55, %v8283_v6  ;;  %v1035_v2 = vrot.slane %v1021_v56, %v8283_v6  ;;  %v1044_v3 = vrot.slane %v1036_v57, %v8283_v6  ;;  %v1051_v4 = vrot.slane %v1037_v59, %v8283_v6 }
 0x233   : > { %v1726_v55 = vsel %vm1272_vm2, %v966_v51, 0 }
 0x234   : > { %v1056_v5 = vcombine.low %v1028_v63, %v1035_v2  ;;  %v6773_v7 = vcombine.high %v1028_v63, %v1035_v2  ;;  %v1072_v8 = vcombine.low %v1044_v3, %v1051_v4  ;;  %v6774_v9 = vcombine.high %v1044_v3, %v1051_v4 }
 0x235   : > { %v1797_v57 = vand.u32 4294901760, %v1726_v55 }
 0x236   : > { %v1063_v12 = vrot.slane %v1056_v5, %v8281_v61  ;;  %v1071_v13 = vrot.slane %v6773_v7, %v8281_v61  ;;  %v1079_v14 = vrot.slane %v1072_v8, %v8281_v61  ;;  %v1087_v15 = vrot.slane %v6774_v9, %v8281_v61 }
 0x237   : > { %v1798_v35 = vsub.f32 %v1726_v55, %v1797_v57 }
 0x238   : > { %v1088_v16 = vcombine.low %v1063_v12, %v1071_v13  ;;  %v1089_v17 = vcombine.high %v1063_v12, %v1071_v13  ;;  %v1104_v18 = vcombine.low %v1079_v14, %v1087_v15  ;;  %v1105_v19 = vcombine.high %v1079_v14, %v1087_v15 }
 0x239   : > { %v1799_v63 = vand.u32 4294901760, %v1798_v35 }
 0x23a   : > { %v1096_v22 = vrot.slane %v1088_v16, %v8283_v6  ;;  %v1112_v23 = vrot.slane %v1104_v18, %v8283_v6  ;;  %v8344_v24 = vrot.slane %v1089_v17, %v8283_v6  ;;  %v8347_v25 = vrot.slane %v1105_v19, %v8283_v6 }
 0x23b   : > { %v1800_v3 = vsub.f32 %v1798_v35, %v1799_v63 }
 0x23c   : > { %v1120_v26 = vcombine.low %v1096_v22, %v1112_v23  ;;  %v1122_v27 = vcombine.low %v8344_v24, %v8347_v25  ;;  %v1123_v28 = vcombine.high %v8344_v24, %v8347_v25  ;;  %v1121_v54 = vcombine.high %v1096_v22, %v1112_v23 }
 0x23d   : > { %v1801_v5 = vand.u32 4294901760, %v1800_v3 }
 0x23e   : > { %v1277_v32 = vsel %vm1272_vm2, %v1120_v26, 0  ;;  %v2181_v33 = vsel %vm1272_vm2, %v1122_v27, 0  ;;  %v1729_v56 = vsel %vm1272_vm2, %v1121_v54, 0 }
 0x23f   : > { %v1280_v38 = vand.u32 4294901760, %v1277_v32  ;;  %v2184_v39 = vand.u32 4294901760, %v2181_v33  ;;  %v1732_v34 = vand.u32 4294901760, %v1729_v56 }
 0x241   : > { %7097 = vmatpush3.xpose.msra.mxu1 %v1280_v38  ;;  %v1357_v40 = vsub.f32 %v1277_v32, %v1280_v38  ;;  %7157 = vmatpush3.xpose.msra.mxu0 %v2184_v39  ;;  %v2261_v41 = vsub.f32 %v2181_v33, %v2184_v39  ;;  %v1809_v59 = vsub.f32 %v1729_v56, %v1732_v34 }
 0x242   : > { %7101 = vmatprep.subr.mxu1 %v8044_v1  ;;  %7161 = vmatprep.subr.mxu0 %v8044_v1 }
 0x243   : > { %v1358_v44 = vand.u32 4294901760, %v1357_v40  ;;  %v2262_v45 = vand.u32 4294901760, %v2261_v41  ;;  %v1810_v2 = vand.u32 4294901760, %v1809_v59 }
 0x244   : > { %7099 = vmatmul.mubr.f32.vlgmr.msra.gmra.mrb[2].mxu1 %v1349_v42  ;;  %7159 = vmatmul.mubr.f32.vlgmr.msra.gmra.mrb[2].mxu0 %v2253_v43 }
 0x245   : > { %v1359_v47 = vsub.f32 %v1357_v40, %v1358_v44  ;;  %v2263_v48 = vsub.f32 %v2261_v41, %v2262_v45  ;;  %7103 = vmatprep.mubr.msk.f32.mxu1 %vm8043_vm0, %v8044_v1  ;;  %7163 = vmatprep.mubr.msk.f32.mxu0 %vm8043_vm0, %v8044_v1  ;;  %v1811_v4 = vsub.f32 %v1809_v59, %v1810_v2 }
 0x247   : > { %v1360_v49 = vand.u32 4294901760, %v1359_v47  ;;  %v2264_v50 = vand.u32 4294901760, %v2263_v48  ;;  %v1812_v7 = vand.u32 4294901760, %v1811_v4 }
 0x249   : > { %7102 = vmatpush3.xpose.msra.mxu1 %v1360_v49  ;;  %7162 = vmatpush3.xpose.msra.mxu0 %v2264_v50 }
 0x24a   : > { %7106 = vmatprep.subr.mxu1 %v8044_v1  ;;  %7166 = vmatprep.subr.mxu0 %v8044_v1 }
 0x24c   : > { %7104 = vmatmul.mubr.f32.vlgmr.msra.gmra.mrb[2].mxu1 %v8321_v60  ;;  %7164 = vmatmul.mubr.f32.vlgmr.msra.gmra.mrb[2].mxu0 %v8323_v62 }
 0x24d   : > { %7107 = vmatpush3.xpose.msra.mxu1 %v1357_v40  ;;  %7167 = vmatpush3.xpose.msra.mxu0 %v2261_v41 }
 0x24e   : > { %7108 = vmatprep.mubr.msk.f32.mxu1 %vm8043_vm0, %v8044_v1  ;;  %7111 = vmatprep.subr.mxu1 %v8044_v1 }
 0x24f   : > { %7168 = vmatprep.mubr.msk.f32.mxu0 %vm8043_vm0, %v8044_v1  ;;  %7171 = vmatprep.subr.mxu0 %v8044_v1 }
 0x254   : > { %7109 = vmatmul.mubr.f32.vlgmr.msra.gmra.mrb[2].mxu1 %v8330_v10  ;;  %7169 = vmatmul.mubr.f32.vlgmr.msra.gmra.mrb[2].mxu0 %v8333_v11 }
 0x255   : > { %7112 = vmatpush3.xpose.msra.mxu1 %v1280_v38  ;;  %7172 = vmatpush3.xpose.msra.mxu0 %v2184_v39 }
 0x256   : > { %7113 = vmatprep.mubr.msk.f32.mxu1 %vm8043_vm0, %v8044_v1  ;;  %7116 = vmatprep.subr.mxu1 %v8044_v1 }
 0x257   : > { %7173 = vmatprep.mubr.msk.f32.mxu0 %vm8043_vm0, %v8044_v1  ;;  %7176 = vmatprep.subr.mxu0 %v8044_v1 }
 0x25c   : > { %7114 = vmatmul.mubr.f32.vlgmr.msra.gmra.mrb[2].mxu1 %v1347_v20  ;;  %7174 = vmatmul.mubr.f32.vlgmr.msra.gmra.mrb[2].mxu0 %v2251_v21 }
 0x25d   : > { %7117 = vmatpush3.xpose.msra.mxu1 %v1358_v44  ;;  %7177 = vmatpush3.xpose.msra.mxu0 %v2262_v45 }
 0x25e   : > { %7118 = vmatprep.mubr.msk.f32.mxu1 %vm8043_vm0, %v8044_v1  ;;  %7121 = vmatprep.subr.mxu1 %v8044_v1 }
 0x25f   : > { %7178 = vmatprep.mubr.msk.f32.mxu0 %vm8043_vm0, %v8044_v1  ;;  %7181 = vmatprep.subr.mxu0 %v8044_v1 }
 0x264   : > { %7119 = vmatmul.mubr.f32.vlgmr.msra.gmra.mrb[2].mxu1 %v8321_v60  ;;  %7179 = vmatmul.mubr.f32.vlgmr.msra.gmra.mrb[2].mxu0 %v8323_v62 }
 0x265   : > { %7122 = vmatpush3.xpose.msra.mxu1 %v1280_v38  ;;  %7182 = vmatpush3.xpose.msra.mxu0 %v2184_v39 }
 0x266   : > { %7123 = vmatprep.mubr.msk.f32.mxu1 %vm8043_vm0, %v8044_v1  ;;  %7126 = vmatprep.subr.mxu1 %v8044_v1 }
 0x267   : > { %7183 = vmatprep.mubr.msk.f32.mxu0 %vm8043_vm0, %v8044_v1  ;;  %7216 = vmatprep.subr.mxu0 %v8044_v1 }
 0x26c   : > { %7124 = vmatmul.mubr.f32.vlgmr.msra.gmra.mrb[2].mxu1 %v8321_v60  ;;  %7184 = vmatmul.mubr.f32.vlgmr.msra.gmra.mrb[2].mxu0 %v8323_v62  ;;  %v2630_v60 = vsel %vm1272_vm2, %v968_v31, 0  ;;  %v2633_v62 = vsel %vm1272_vm2, %v1123_v28, 0 }
 0x26d   : > { %7127 = vmatpush3.xpose.msra.mxu1 %v1732_v34  ;;  %7128 = vmatprep.mubr.msk.f32.mxu1 %vm8043_vm0, %v8044_v1  ;;  %v2701_v8 = vand.u32 4294901760, %v2630_v60  ;;  %v2636_v9 = vand.u32 4294901760, %v2633_v62 }
 0x26e   : > { %7131 = vmatprep.subr.mxu1 %v8044_v1  ;;  %7218 = vmatprep.mubr.msk.f32.mxu0 %vm8043_vm0, %v8044_v1 }
 0x26f   : > { %v2702_v10 = vsub.f32 %v2630_v60, %v2701_v8  ;;  %v2713_v11 = vsub.f32 %v2633_v62, %v2636_v9 }
 0x270   : > { %7129 = vmatmul.mubr.f32.vlgmr.msra.gmra.mrb[4].mxu1 %v1801_v5 }
 0x271   : > { %7132 = vmatpush3.xpose.msra.mxu1 %v1812_v7  ;;  %7133 = vmatprep.mubr.msk.f32.mxu1 %vm8043_vm0, %v8044_v1  ;;  %v2703_v29 = vand.u32 4294901760, %v2702_v10  ;;  %v2714_v30 = vand.u32 4294901760, %v2713_v11 }
 0x272   : > { %7136 = vmatprep.subr.mxu1 %v8044_v1 }
 0x273   : > { %v2704_v31 = vsub.f32 %v2702_v10, %v2703_v29  ;;  %v2715_v12 = vsub.f32 %v2713_v11, %v2714_v30 }
 0x275   : > { %v2705_v13 = vand.u32 4294901760, %v2704_v31  ;;  %v2716_v14 = vand.u32 4294901760, %v2715_v12 }
 0x278   : > { %7134 = vmatmul.mubr.f32.vlgmr.msra.gmra.mrb[4].mxu1 %v1797_v57 }
 0x279   : > { %7137 = vmatpush3.xpose.msra.mxu1 %v1809_v59  ;;  %7138 = vmatprep.mubr.msk.f32.mxu1 %vm8043_vm0, %v8044_v1 }
 0x27a   : > { %7141 = vmatprep.subr.mxu1 %v8044_v1 }
 0x280   : > { %7139 = vmatmul.mubr.f32.vlgmr.msra.gmra.mrb[4].mxu1 %v1798_v35 }
 0x281   : > { %7142 = vmatpush3.xpose.msra.mxu1 %v1732_v34  ;;  %7143 = vmatprep.mubr.msk.f32.mxu1 %vm8043_vm0, %v8044_v1 }
 0x282   : > { %7146 = vmatprep.subr.mxu1 %v8044_v1 }
 0x288   : > { %7144 = vmatmul.mubr.f32.vlgmr.msra.gmra.mrb[4].mxu1 %v1799_v63 }
 0x289   : > { %7147 = vmatpush3.xpose.msra.mxu1 %v1810_v2  ;;  %7148 = vmatprep.mubr.msk.f32.mxu1 %vm8043_vm0, %v8044_v1 }
 0x28a   : > { %7151 = vmatprep.subr.mxu1 %v8044_v1 }
 0x290   : > { %7149 = vmatmul.mubr.f32.vlgmr.msra.gmra.mrb[4].mxu1 %v1797_v57 }
 0x291   : > { %7152 = vmatpush3.xpose.msra.mxu1 %v1732_v34  ;;  %7153 = vmatprep.mubr.msk.f32.mxu1 %vm8043_vm0, %v8044_v1 }
 0x292   : > { %7186 = vmatprep.subr.mxu1 %v8044_v1 }
 0x298   : > { %7154 = vmatmul.mubr.f32.vlgmr.msra.gmra.mrb[4].mxu1 %v1797_v57 }
 0x299   : > { %7187 = vmatpush3.xpose.msra.mxu1 %v2636_v9  ;;  %7188 = vmatprep.mubr.msk.f32.mxu1 %vm8043_vm0, %v8044_v1 }
 0x29a   : > { %7191 = vmatprep.subr.mxu1 %v8044_v1 }
 0x29c   : > { %7189 = vmatmul.mubr.f32.vlgmr.msra.gmra.mrb[6].mxu1 %v2705_v13 }
 0x29d   : > { %7192 = vmatpush3.xpose.msra.mxu1 %v2716_v14  ;;  %7193 = vmatprep.mubr.msk.f32.mxu1 %vm8043_vm0, %v8044_v1 }
 0x29e   : > { %7196 = vmatprep.subr.mxu1 %v8044_v1 }
 0x2a4   : > { %7194 = vmatmul.mubr.f32.vlgmr.msra.gmra.mrb[6].mxu1 %v2701_v8 }
 0x2a5   : > { %7197 = vmatpush3.xpose.msra.mxu1 %v2713_v11  ;;  %7198 = vmatprep.mubr.msk.f32.mxu1 %vm8043_vm0, %v8044_v1 }
 0x2a6   : > { %7201 = vmatprep.subr.mxu1 %v8044_v1 }
 0x2ac   : > { %7199 = vmatmul.mubr.f32.vlgmr.msra.gmra.mrb[6].mxu1 %v2702_v10 }
 0x2ad   : > { %7202 = vmatpush3.xpose.msra.mxu1 %v2636_v9  ;;  %7203 = vmatprep.mubr.msk.f32.mxu1 %vm8043_vm0, %v8044_v1 }
 0x2ae   : > { %7206 = vmatprep.subr.mxu1 %v8044_v1 }
 0x2b4   : > { %7204 = vmatmul.mubr.f32.vlgmr.msra.gmra.mrb[6].mxu1 %v2703_v29 }
 0x2b5   : > { %7207 = vmatpush3.xpose.msra.mxu1 %v2714_v30  ;;  %7208 = vmatprep.mubr.msk.f32.mxu1 %vm8043_vm0, %v8044_v1 }
 0x2b6   : > { %7211 = vmatprep.subr.mxu1 %v8044_v1 }
 0x2bc   : > { %7209 = vmatmul.mubr.f32.vlgmr.msra.gmra.mrb[6].mxu1 %v2701_v8 }
 0x2bd   : > { %7212 = vmatpush3.xpose.msra.mxu1 %v2636_v9  ;;  %7213 = vmatprep.mubr.msk.f32.mxu1 %vm8043_vm0, %v8044_v1 }
 0x2be   : > { %7246 = vmatprep.subr.mxu1 %v8044_v1 }
 0x2c4   : > { %7214 = vmatmul.mubr.f32.vlgmr.msra.gmra.mrb[6].mxu1 %v2701_v8 }
 0x2c5   : > { %7248 = vmatprep.mubr.msk.f32.mxu1 %vm8043_vm0, %v8044_v1 }
 0x33f   : > { %v1721_v15 = vpop.f32.mrb[2].mxu1  ;;  %v2625_v16 = vpop.f32.mrb[2].mxu0 }
 0x340   : > { %v7125_v17 = vpop.f32.mrb[3].mxu1  ;;  %v7185_v18 = vpop.f32.mrb[3].mxu0  ;;  %v3081_v19 = vsel %vm1272_vm2, %v1721_v15, -inf  ;;  %v3087_v20 = vsel %vm1272_vm2, %v2625_v16, -inf }
 0x341   : > { %3082 = vmax.xlane.f32.xlu0 %v3081_v19 }
 0x345   : > { %3088 = vmax.xlane.f32.xlu0 %v3087_v20 }
 0x36b   : > { %v2173_v21 = vpop.f32.mrb[4].mxu1 }
 0x36c   : > { %v7155_v22 = vpop.f32.mrb[5].mxu1  ;;  %v3084_v23 = vsel %vm1272_vm2, %v2173_v21, -inf }
 0x36d   : > { %3085 = vmax.xlane.f32.xlu1 %v3084_v23 }
 0x37e   : > { %1124 = vrot.lane.b32.xlu1 %v8265_v46, %s8051_s23 }
 0x397   : > { %v3077_v24 = vpop.f32.mrb[6].mxu1 }
 0x398   : > { %v7215_v25 = vpop.f32.mrb[7].mxu1  ;;  %v3090_v26 = vsel %vm1272_vm2, %v3077_v24, -inf }
 0x399   : > { %3091 = vmax.xlane.f32.xlu0 %v3090_v26 }
 0x3ce   : > { %v3083_v27 = vpop.xlane.xlu0 %3082 }
 0x3cf   : > { %v3093_v28 = vsub.f32 %v1721_v15, %v3083_v27 }
 0x3d1   : > { %v3097_v32 = vmul.f32 1.442695, %v3093_v28 }
 0x3d2   : > { %v3089_v41 = vpop.xlane.xlu0 %3088 }
 0x3d3   : > { %7922 = vpow2.f32 %v3097_v32  ;;  %v3095_v45 = vsub.f32 %v2625_v16, %v3089_v41 }
 0x3d5   : > { %v3101_v47 = vmul.f32 1.442695, %v3095_v45 }
 0x3dd   : > { %v7923_v33 = vpop.eup %7922 }
 0x3de   : > { %v3105_v36 = vsel %vm1272_vm2, %v7923_v33, 0.0 }
 0x3df   : > { %3106 = vadd.xlane.f32.xlu1 %v3105_v36 }
 0x3f0   : > { %1128 = vrot.lane.b32.xlu1 %v8277_v58, %s8051_s23 }
 0x3f4   : > { %1130 = vrot.lane.b32.xlu1 %v8272_v52, %s8051_s23 }
 0x3fa   : > { %v3086_v37 = vpop.xlane.xlu1 %3085 }
 0x3fb   : > { %v3094_v38 = vsub.f32 %v2173_v21, %v3086_v37 }
 0x3fd   : > { %v3099_v46 = vmul.f32 1.442695, %v3094_v38 }
 0x3ff   : > { %7924 = vpow2.f32 %v3099_v46 }
 0x409   : > { %v7925_v39 = vpop.eup %7924 }
 0x40a   : > { %v3108_v40 = vsel %vm1272_vm2, %v7925_v39, 0.0 }
 0x40b   : > { %3109 = vadd.xlane.f32.xlu0 %v3108_v40 }
 0x421   : > { %1126 = vrot.lane.b32.xlu0 %v8274_v53, %s8051_s23  ;;  %v1125_v53 = vpop.permute.xlu1 %1124  ;;  %s8053_s23 = smov 8  }
 0x426   : > { %v3092_v42 = vpop.xlane.xlu0 %3091 }
 0x427   : > { %v3096_v43 = vsub.f32 %v3077_v24, %v3092_v42 }
 0x429   : > { %v3103_v44 = vmul.f32 1.442695, %v3096_v43 }
 0x42b   : > { %7926 = vpow2.f32 %v3103_v44 }
 0x42c   : > { %7928 = vpow2.f32 %v3101_v47 }
 0x435   : > { %v8459_v58 = vpop.eup %7926 }
 0x436   : > { %v3114_v52 = vsel %vm1272_vm2, %v8459_v58, 0.0  ;;  %v8463_v48 = vpop.eup %7928 }
 0x437   : > { %3115 = vadd.xlane.f32.xlu1 %v3114_v52  ;;  %v3111_v49 = vsel %vm1272_vm2, %v8463_v48, 0.0 }
 0x440   : > { %3112 = vadd.xlane.f32.xlu0 %v3111_v49 }
 0x46c   : > { %v3107_v50 = vpop.xlane.xlu1 %3106 }
 0x46d   : > { %7930 = vrcp.f32 %v3107_v50 }
 0x470   : > { %v1129_v54 = vpop.permute.xlu1 %1128 }
 0x471   : > { %v1136_v57 = vcombine.low %v1125_v53, %v1129_v54  ;;  %v1137_v34 = vcombine.high %v1125_v53, %v1129_v54 }
 0x473   : > { %v1144_v4 = vrot.slane %v1136_v57, %v8281_v61  ;;  %v1151_v5 = vrot.slane %v1137_v34, %v8281_v61 }
 0x474   : > { %v1131_v35 = vpop.permute.xlu1 %1130 }
 0x477   : > { %v7931_v51 = vpop.eup %7930 }
 0x478   : > { %v3118_v56 = vmul.f32 %v7931_v51, %v7923_v33 }
 0x47a   : > { %v3126_v3 = vsel %vm1272_vm2, %v3118_v56, 0 }
 0x47b   : > { %v8472_v62 = vand.u32 4294901760, %v3126_v3 }
 0x47d   : > { %v8479_v15 = vsub.f32 %v3126_v3, %v8472_v62 }
 0x47f   : > { %v3196_v25 = vand.u32 4294901760, %v8479_v15 }
 0x481   : > { %v3197_v37 = vsub.f32 %v8479_v15, %v3196_v25 }
 0x483   : > { %v3198_v43 = vand.u32 4294901760, %v3197_v37  ;;  %v5081_v37 = vld [vmem:[%s8935_s3 + $0x8] sm:$0xff] }
 0x498   : > { %v3110_v55 = vpop.xlane.xlu0 %3109 }
 0x499   : > { %7932 = vrcp.f32 %v3110_v55 }
 0x49c   : > { %v1127_v59 = vpop.permute.xlu0 %1126 }
 0x49d   : > { %v1152_v63 = vcombine.low %v1127_v59, %v1131_v35  ;;  %v1153_v2 = vcombine.high %v1127_v59, %v1131_v35 }
 0x49f   : > { %v1160_v7 = vrot.slane %v1152_v63, %v8281_v61  ;;  %v1167_v60 = vrot.slane %v1153_v2, %v8281_v61 }
 0x4a1   : > { %v1168_v8 = vcombine.low %v1144_v4, %v1160_v7  ;;  %v1169_v9 = vcombine.high %v1144_v4, %v1160_v7  ;;  %v1184_v10 = vcombine.low %v1151_v5, %v1167_v60  ;;  %v1185_v11 = vcombine.high %v1151_v5, %v1167_v60 }
 0x4a3   : > { %v7933_v29 = vpop.eup %7932  ;;  %v1176_v30 = vrot.slane %v1168_v8, %v8283_v6  ;;  %v1183_v31 = vrot.slane %v1169_v9, %v8283_v6  ;;  %v1192_v12 = vrot.slane %v1184_v10, %v8283_v6  ;;  %v1199_v13 = vrot.slane %v1185_v11, %v8283_v6 }
 0x4a4   : > { %v3120_v14 = vmul.f32 %v7933_v29, %v7925_v39 }
 0x4a5   : > { %v1204_v16 = vcombine.low %v1176_v30, %v1183_v31  ;;  %v6775_v17 = vcombine.high %v1176_v30, %v1183_v31  ;;  %v1220_v18 = vcombine.low %v1192_v12, %v1199_v13  ;;  %v6776_v19 = vcombine.high %v1192_v12, %v1199_v13 }
 0x4a6   : > { %v3575_v20 = vsel %vm1272_vm2, %v3120_v14, 0 }
 0x4a7   : > { %v1211_v21 = vrot.slane %v1204_v16, %v8281_v61  ;;  %v1219_v22 = vrot.slane %v6775_v17, %v8281_v61  ;;  %v1227_v23 = vrot.slane %v1220_v18, %v8281_v61  ;;  %v1235_v24 = vrot.slane %v6776_v19, %v8281_v61 }
 0x4a8   : > { %v8487_v26 = vand.u32 4294901760, %v3575_v20 }
 0x4a9   : > { %v1236_v27 = vcombine.low %v1211_v21, %v1219_v22  ;;  %v1252_v28 = vcombine.low %v1227_v23, %v1235_v24  ;;  %v1237_v55 = vcombine.high %v1211_v21, %v1219_v22  ;;  %v1253_v56 = vcombine.high %v1227_v23, %v1235_v24 }
 0x4aa   : > { %v3644_v32 = vsub.f32 %v3575_v20, %v8487_v26 }
 0x4ab   : > { %v1244_v33 = vrot.slane %v1236_v27, %v8283_v6  ;;  %v1260_v36 = vrot.slane %v1252_v28, %v8283_v6  ;;  %v1251_v34 = vrot.slane %v1237_v55, %v8283_v6  ;;  %v1267_v35 = vrot.slane %v1253_v56, %v8283_v6 }
 0x4ac   : > { %v3645_v38 = vand.u32 4294901760, %v3644_v32 }
 0x4ad   : > { %v1268_v46 = vcombine.low %v1244_v33, %v1260_v36  ;;  %v1269_v39 = vcombine.high %v1244_v33, %v1260_v36  ;;  %v1271_v59 = vcombine.high %v1251_v34, %v1267_v35  ;;  %v1270_v5 = vcombine.low %v1251_v34, %v1267_v35  ;;  %v5080_v36 = vld [vmem:[%s8935_s3] sm:$0xff] }
 0x4ae   : > { %v3646_v40 = vsub.f32 %v3644_v32, %v3645_v38 }
 0x4af   : > { %v8493_v41 = vand.u32 4294901760, %v1268_v46  ;;  %v8495_v42 = vand.u32 4294901760, %v1269_v39  ;;  %v8534_v2 = vand.u32 4294901760, %v1271_v59 }
 0x4b0   : > { %v3647_v44 = vand.u32 4294901760, %v3646_v40 }
 0x4b1   : > { %7217 = vmatpush3.msra.mxu0 %v8493_v41  ;;  %v3206_v45 = vsub.f32 %v1268_v46, %v8493_v41  ;;  %7247 = vmatpush3.msra.mxu1 %v8495_v42  ;;  %v3655_v47 = vsub.f32 %v1269_v39, %v8495_v42  ;;  %v4553_v7 = vsub.f32 %v1271_v59, %v8534_v2  ;;  %v5095_v46 = vand.u32 4294901760, %v5081_v37 }
 0x4b2   : > { %7219 = vmatmul.mubr.f32.vlgmr.msra.gmra.mrb[4].mxu0 %v3198_v43  ;;  %7249 = vmatmul.mubr.f32.vlgmr.msra.gmra.mrb[8].mxu1 %v3647_v44 }
 0x4b3   : > { %7221 = vmatprep.subr.mxu0 %v8044_v1  ;;  %7251 = vmatprep.subr.mxu1 %v8044_v1  ;;  %v3207_v52 = vand.u32 4294901760, %v3206_v45  ;;  %v3656_v49 = vand.u32 4294901760, %v3655_v47  ;;  %v4554_v10 = vand.u32 4294901760, %v4553_v7  ;;  %v8616_v40 = vsub.f32 %v5081_v37, %v5095_v46 }
 0x4b4   : > { %7223 = vmatprep.mubr.msk.f32.mxu0 %vm8043_vm0, %v8044_v1  ;;  %7253 = vmatprep.mubr.msk.f32.mxu1 %vm8043_vm0, %v8044_v1 }
 0x4b5   : > { %v3208_v53 = vsub.f32 %v3206_v45, %v3207_v52  ;;  %v3657_v50 = vsub.f32 %v3655_v47, %v3656_v49  ;;  %v4555_v13 = vsub.f32 %v4553_v7, %v4554_v10 }
 0x4b7   : > { %v3209_v51 = vand.u32 4294901760, %v3208_v53  ;;  %v3658_v54 = vand.u32 4294901760, %v3657_v50 }
 0x4b9   : > { %7222 = vmatpush3.msra.mxu0 %v3209_v51  ;;  %7252 = vmatpush3.msra.mxu1 %v3658_v54 }
 0x4ba   : > { %7224 = vmatmul.mubr.f32.vlgmr.msra.gmra.mrb[4].mxu0 %v8472_v62  ;;  %7226 = vmatprep.subr.mxu0 %v8044_v1 }
 0x4bb   : > { %7254 = vmatmul.mubr.f32.vlgmr.msra.gmra.mrb[8].mxu1 %v8487_v26  ;;  %7256 = vmatprep.subr.mxu1 %v8044_v1 }
 0x4bc   : > { %7227 = vmatpush3.msra.mxu0 %v3206_v45  ;;  %7257 = vmatpush3.msra.mxu1 %v3655_v47  ;;  %v5180_v45 = vand.u32 4294901760, %v8616_v40 }
 0x4bd   : > { %7228 = vmatprep.mubr.msk.f32.mxu0 %vm8043_vm0, %v8044_v1  ;;  %7231 = vmatprep.subr.mxu0 %v8044_v1 }
 0x4be   : > { %7258 = vmatprep.mubr.msk.f32.mxu1 %vm8043_vm0, %v8044_v1  ;;  %7261 = vmatprep.subr.mxu1 %v8044_v1  ;;  %v5181_v54 = vsub.f32 %v8616_v40, %v5180_v45 }
 0x4c2   : > { %7229 = vmatmul.mubr.f32.vlgmr.msra.gmra.mrb[4].mxu0 %v8479_v15 }
 0x4c3   : > { %7232 = vmatpush3.msra.mxu0 %v8493_v41  ;;  %7259 = vmatmul.mubr.f32.vlgmr.msra.gmra.mrb[8].mxu1 %v3644_v32 }
 0x4c4   : > { %7262 = vmatpush3.msra.mxu1 %v8495_v42  ;;  %v3116_v57 = vpop.xlane.xlu1 %3115  ;;  %7233 = vmatprep.mubr.msk.f32.mxu0 %vm8043_vm0, %v8044_v1 }
 0x4c5   : > { %7934 = vrcp.f32 %v3116_v57  ;;  %7236 = vmatprep.subr.mxu0 %v8044_v1  ;;  %7263 = vmatprep.mubr.msk.f32.mxu1 %vm8043_vm0, %v8044_v1 }
 0x4c6   : > { %7266 = vmatprep.subr.mxu1 %v8044_v1 }
 0x4ca   : > { %7234 = vmatmul.mubr.f32.vlgmr.msra.gmra.mrb[4].mxu0 %v3196_v25 }
 0x4cb   : > { %7237 = vmatpush3.msra.mxu0 %v3207_v52  ;;  %7264 = vmatmul.mubr.f32.vlgmr.msra.gmra.mrb[8].mxu1 %v3645_v38  ;;  %v5092_v38 = vand.u32 4294901760, %v5080_v36 }
 0x4cc   : > { %7267 = vmatpush3.msra.mxu1 %v3656_v49  ;;  %7238 = vmatprep.mubr.msk.f32.mxu0 %vm8043_vm0, %v8044_v1 }
 0x4cd   : > { %v3113_v63 = vpop.xlane.xlu0 %3112  ;;  %7241 = vmatprep.subr.mxu0 %v8044_v1  ;;  %7268 = vmatprep.mubr.msk.f32.mxu1 %vm8043_vm0, %v8044_v1  ;;  %v8614_v39 = vsub.f32 %v5080_v36, %v5092_v38 }
 0x4ce   : > { %7936 = vrcp.f32 %v3113_v63  ;;  %7271 = vmatprep.subr.mxu1 %v8044_v1 }
 0x4cf   : > { %v7935_v3 = vpop.eup %7934  ;;  %v5173_v44 = vand.u32 4294901760, %v8614_v39 }
 0x4d0   : > { %v3124_v4 = vmul.f32 %v7935_v3, %v8459_v58  ;;  %v8550_v58 = vand.u32 4294901760, %v1270_v5 }
 0x4d1   : > { %v5174_v51 = vsub.f32 %v8614_v39, %v5173_v44 }
 0x4d2   : > { %7239 = vmatmul.mubr.f32.vlgmr.msra.gmra.mrb[4].mxu0 %v8472_v62  ;;  %v4473_v60 = vsel %vm1272_vm2, %v3124_v4, 0  ;;  %v4104_v31 = vsub.f32 %v1270_v5, %v8550_v58 }
 0x4d3   : > { %7242 = vmatpush3.msra.mxu0 %v8493_v41  ;;  %7269 = vmatmul.mubr.f32.vlgmr.msra.gmra.mrb[8].mxu1 %v8487_v26  ;;  %v8542_v8 = vand.u32 4294901760, %v4473_v60  ;;  %v5082_v41 = vld [vmem:[%s8935_s3 + $0x10] sm:$0xff]  ;;  %v5175_v63 = vand.u32 4294901760, %v5174_v51 }
 0x4d4   : > { %7272 = vmatpush3.msra.mxu1 %v8495_v42  ;;  %7243 = vmatprep.mubr.msk.f32.mxu0 %vm8043_vm0, %v8044_v1  ;;  %v5083_v42 = vld [vmem:[%s8935_s3 + $0x18] sm:$0xff]  ;;  %v5098_v47 = vand.u32 4294901760, %v5082_v41 }
 0x4d5   : > { %7273 = vmatprep.mubr.msk.f32.mxu1 %vm8043_vm0, %v8044_v1  ;;  %7276 = vmatprep.subr.mxu0 %v8044_v1  ;;  %v4542_v9 = vsub.f32 %v4473_v60, %v8542_v8  ;;  %v5101_v52 = vand.u32 4294901760, %v5083_v42 }
 0x4d6   : > { %7306 = vmatprep.subr.mxu1 %v8044_v1  ;;  %v8632_v55 = vsub.f32 %v5082_v41, %v5098_v47 }
 0x4d7   : > { %v4543_v11 = vand.u32 4294901760, %v4542_v9  ;;  %v8634_v56 = vsub.f32 %v5083_v42, %v5101_v52 }
 0x4d8   : > { %v7937_v29 = vpop.eup %7936  ;;  %v5187_v3 = vand.u32 4294901760, %v8632_v55 }
 0x4d9   : > { %v3122_v30 = vmul.f32 %v7937_v29, %v8463_v48  ;;  %v4544_v12 = vsub.f32 %v4542_v9, %v4543_v11  ;;  %v4105_v48 = vand.u32 4294901760, %v4104_v31  ;;  %v5194_v4 = vand.u32 4294901760, %v8634_v56 }
 0x4da   : > { %7244 = vmatmul.mubr.f32.vlgmr.msra.gmra.mrb[4].mxu0 %v8472_v62  ;;  %v4556_v62 = vand.u32 4294901760, %v4555_v13 }
 0x4db   : > { %7274 = vmatmul.mubr.f32.vlgmr.msra.gmra.mrb[8].mxu1 %v8487_v26  ;;  %7277 = vmatpush3.msra.mxu0 %v8550_v58  ;;  %v4545_v14 = vand.u32 4294901760, %v4544_v12  ;;  %v4024_v15 = vsel %vm1272_vm2, %v3122_v30, 0  ;;  %v4106_v19 = vsub.f32 %v4104_v31, %v4105_v48  ;;  %v5195_v12 = vsub.f32 %v8634_v56, %v5194_v4 }
 0x4dc   : > { %7307 = vmatpush3.msra.mxu1 %v8534_v2  ;;  %7308 = vmatprep.mubr.msk.f32.mxu1 %vm8043_vm0, %v8044_v1  ;;  %v4092_v16 = vand.u32 4294901760, %v4024_v15  ;;  %v7646_v42 = vpack.c.bf16 %v5194_v4, %v5187_v3 }
 0x4dd   : > { %7311 = vmatprep.subr.mxu1 %v8044_v1  ;;  %7278 = vmatprep.mubr.msk.f32.mxu0 %vm8043_vm0, %v8044_v1  ;;  %v4107_v22 = vand.u32 4294901760, %v4106_v19 }
 0x4de   : > { %7281 = vmatprep.subr.mxu0 %v8044_v1  ;;  %v4093_v17 = vsub.f32 %v4024_v15, %v4092_v16 }
 0x4df   : > { %7309 = vmatmul.mubr.f32.vlgmr.msra.gmra.mrb[10].mxu1 %v4545_v14 }
 0x4e0   : > { %7312 = vmatpush3.msra.mxu1 %v4556_v62  ;;  %7313 = vmatprep.mubr.msk.f32.mxu1 %vm8043_vm0, %v8044_v1  ;;  %v4094_v18 = vand.u32 4294901760, %v4093_v17 }
 0x4e1   : > { %7316 = vmatprep.subr.mxu1 %v8044_v1 }
 0x4e2   : > { %v4095_v20 = vsub.f32 %v4093_v17, %v4094_v18 }
 0x4e4   : > { %v4096_v21 = vand.u32 4294901760, %v4095_v20 }
 0x4e6   : > { %7279 = vmatmul.mubr.f32.vlgmr.msra.gmra.mrb[6].mxu0 %v4096_v21 }
 0x4e7   : > { %7282 = vmatpush3.msra.mxu0 %v4107_v22  ;;  %7314 = vmatmul.mubr.f32.vlgmr.msra.gmra.mrb[10].mxu1 %v8542_v8 }
 0x4e8   : > { %7317 = vmatpush3.msra.mxu1 %v4553_v7  ;;  %7283 = vmatprep.mubr.msk.f32.mxu0 %vm8043_vm0, %v8044_v1 }
 0x4e9   : > { %7286 = vmatprep.subr.mxu0 %v8044_v1  ;;  %7318 = vmatprep.mubr.msk.f32.mxu1 %vm8043_vm0, %v8044_v1 }
 0x4ea   : > { %7321 = vmatprep.subr.mxu1 %v8044_v1 }
 0x4ee   : > { %7284 = vmatmul.mubr.f32.vlgmr.msra.gmra.mrb[6].mxu0 %v4092_v16 }
 0x4ef   : > { %7287 = vmatpush3.msra.mxu0 %v4104_v31  ;;  %7319 = vmatmul.mubr.f32.vlgmr.msra.gmra.mrb[10].mxu1 %v4542_v9  ;;  %v5188_v9 = vsub.f32 %v8632_v55, %v5187_v3 }
 0x4f0   : > { %7322 = vmatpush3.msra.mxu1 %v8534_v2  ;;  %7288 = vmatprep.mubr.msk.f32.mxu0 %vm8043_vm0, %v8044_v1 }
 0x4f1   : > { %7291 = vmatprep.subr.mxu0 %v8044_v1  ;;  %7323 = vmatprep.mubr.msk.f32.mxu1 %vm8043_vm0, %v8044_v1  ;;  %v5189_v31 = vand.u32 4294901760, %v5188_v9 }
 0x4f2   : > { %7326 = vmatprep.subr.mxu1 %v8044_v1 }
 0x4f6   : > { %7289 = vmatmul.mubr.f32.vlgmr.msra.gmra.mrb[6].mxu0 %v4093_v17 }
 0x4f7   : > { %7292 = vmatpush3.msra.mxu0 %v8550_v58  ;;  %7324 = vmatmul.mubr.f32.vlgmr.msra.gmra.mrb[10].mxu1 %v4543_v11 }
 0x4f8   : > { %7327 = vmatpush3.msra.mxu1 %v4554_v10  ;;  %7293 = vmatprep.mubr.msk.f32.mxu0 %vm8043_vm0, %v8044_v1 }
 0x4f9   : > { %7296 = vmatprep.subr.mxu0 %v8044_v1  ;;  %7328 = vmatprep.mubr.msk.f32.mxu1 %vm8043_vm0, %v8044_v1 }
 0x4fa   : > { %7331 = vmatprep.subr.mxu1 %v8044_v1 }
 0x4fe   : > { %7294 = vmatmul.mubr.f32.vlgmr.msra.gmra.mrb[6].mxu0 %v4094_v18 }
 0x4ff   : > { %7297 = vmatpush3.msra.mxu0 %v4105_v48  ;;  %7329 = vmatmul.mubr.f32.vlgmr.msra.gmra.mrb[10].mxu1 %v8542_v8  ;;  %v5196_v48 = vand.u32 4294901760, %v5195_v12 }
 0x500   : > { %7332 = vmatpush3.msra.mxu1 %v8534_v2  ;;  %7298 = vmatprep.mubr.msk.f32.mxu0 %vm8043_vm0, %v8044_v1  ;;  %v5182_v2 = vand.u32 4294901760, %v5181_v54 }
 0x501   : > { %7301 = vmatprep.subr.mxu0 %v8044_v1  ;;  %7333 = vmatprep.mubr.msk.f32.mxu1 %vm8043_vm0, %v8044_v1  ;;  %v7628_v20 = vpack.c.bf16 %v5196_v48, %v5189_v31 }
 0x502   : > { %7624 = vmatprep.subr.bf16.mxu1 %v8042_v0 }
 0x506   : > { %7299 = vmatmul.mubr.f32.vlgmr.msra.gmra.mrb[6].mxu0 %v4092_v16 }
 0x507   : > { %7302 = vmatpush3.msra.mxu0 %v8550_v58  ;;  %7334 = vmatmul.mubr.f32.vlgmr.msra.gmra.mrb[10].mxu1 %v8542_v8  ;;  %v7625_v58 = vpack.c.bf16 %v5182_v2, %v5175_v63 }
 0x508   : > { %7303 = vmatprep.mubr.msk.f32.mxu0 %vm8043_vm0, %v8044_v1  ;;  %7618 = vmatprep.subr.bf16.mxu0 %v8042_v0 }
 0x509   : > { %7355 = vmatprep.mubr.msk.f32.mxu1 %vm8043_vm0, %v8044_v1  ;;  %7626 = vmatpush3.bf16.msra.mxu1 %v7625_v58 }
 0x50a   : > { %7627 = vmatprep.subr.bf16.mxu1 %v8042_v0 }
 0x50d   : > { %7629 = vmatpush3.bf16.msra.mxu1 %v7628_v20 }
 0x50e   : > { %7304 = vmatmul.mubr.f32.vlgmr.msra.gmra.mrb[6].mxu0 %v4092_v16  ;;  %7636 = vmatprep.subr.bf16.mxu1 %v8042_v0 }
 0x50f   : > { %7344 = vmatprep.mubr.msk.f32.mxu0 %vm8043_vm0, %v8044_v1 }
 0x5ad   : > { %v3570_v23 = vpop.f32.mrb[4].mxu0 }
 0x5ae   : > { %v4019_v24 = vpop.f32.mrb[8].mxu1  ;;  %v7245_v25 = vpop.f32.mrb[5].mxu0 }
 0x5af   : > { %v7275_v26 = vpop.f32.mrb[9].mxu1  ;;  %v7619_v25 = vpack.c.bf16 %v5095_v46, %v5092_v38  ;;  %v7634_v38 = vpack.c.bf16 %v8634_v56, %v8632_v55  ;;  %v7643_v46 = vpack.c.bf16 %v5180_v45, %v5173_v44  ;;  %v6779_v56 = vld [vmem:[%s8939_s7] ss:$0 sm:$0xff] }
 0x5b1   : > { %7620 = vmatpush3.bf16.msra.mxu0 %v7619_v25 }
 0x5b2   : > { %7621 = vmatprep.subr.bf16.mxu0 %v8042_v0 }
 0x5da   : > { %v4917_v27 = vpop.f32.mrb[10].mxu1 }
 0x5db   : > { %v4937_v28 = vcombine.low %v4019_v24, %v4917_v27  ;;  %v4938_v32 = vcombine.high %v4019_v24, %v4917_v27  ;;  %v7335_v33 = vpop.f32.mrb[11].mxu1 }
 0x5dc   : > { %v7622_v33 = vpack.c.bf16 %v5101_v52, %v5098_v47 }
 0x5dd   : > { %v4945_v57 = vrot.slane %v4937_v28, %v8281_v61  ;;  %v4952_v34 = vrot.slane %v4938_v32, %v8281_v61 }
 0x5de   : > { %7623 = vmatpush3.bf16.msra.mxu0 %v7622_v33 }
 0x5df   : > { %7630 = vmatprep.subr.bf16.mxu0 %v8042_v0 }
 0x5e1   : > { %v4468_v43 = vpop.f32.mrb[6].mxu0 }
 0x5e2   : > { %v4921_v49 = vcombine.low %v3570_v23, %v4468_v43  ;;  %v4922_v53 = vcombine.high %v3570_v23, %v4468_v43  ;;  %v7305_v50 = vpop.f32.mrb[7].mxu0 }
 0x5e4   : > { %v4929_v35 = vrot.slane %v4921_v49, %v8281_v61  ;;  %v4936_v59 = vrot.slane %v4922_v53, %v8281_v61 }
 0x5e6   : > { %v4953_v5 = vcombine.low %v4929_v35, %v4945_v57  ;;  %v4954_v7 = vcombine.high %v4929_v35, %v4945_v57  ;;  %v4969_v60 = vcombine.low %v4936_v59, %v4952_v34  ;;  %v4970_v8 = vcombine.high %v4936_v59, %v4952_v34 }
 0x5e8   : > { %v4961_v10 = vrot.slane %v4953_v5, %v8283_v6  ;;  %v4968_v11 = vrot.slane %v4954_v7, %v8283_v6  ;;  %v4977_v29 = vrot.slane %v4969_v60, %v8283_v6  ;;  %v4984_v30 = vrot.slane %v4970_v8, %v8283_v6 }
 0x5ea   : > { %v4989_v13 = vcombine.low %v4961_v10, %v4968_v11  ;;  %v6777_v14 = vcombine.high %v4961_v10, %v4968_v11  ;;  %v5005_v15 = vcombine.low %v4977_v29, %v4984_v30  ;;  %v6778_v16 = vcombine.high %v4977_v29, %v4984_v30  ;;  %v7942_v30 = vld [vmem:[%s8212_s10] sm:$0xff]  ;;  %s320_s10 = scalar_lea.vmem [#allocation5], %s6768_s21  ;;  %s7977_s21 = sshll.u32 %s8055_s9, 4  ;;  %s7978_s21 = int_to_ptr.vmem [resolvable:$false] %s7977_s21 }
 0x5eb   : > { %s6692_s16 = sshll.u32 %s320_s10, 4  ;;  %s7979_s20 = scalar_lea.vmem %s7978_s21, 256  ;;  %s8889_s16 = int_to_ptr.vmem [resolvable:$true] %s6692_s16 }
 0x5ec   : > { %v4996_v62 = vrot.slane %v4989_v13, %v8281_v61  ;;  %v5004_v17 = vrot.slane %v6777_v14, %v8281_v61  ;;  %v5012_v18 = vrot.slane %v5005_v15, %v8281_v61  ;;  %v5020_v19 = vrot.slane %v6778_v16, %v8281_v61  ;;  %s7973_s15 = scalar_lea.vmem %s8889_s16, 128  ;;  %p7980_p7 = scmp.lt.s32.totalorder %s8889_s16, %s7978_s21 }
 0x5ed   : > { %p7974_p6 = scmp.ne.s32.totalorder %s8889_s16, %s7973_s15  ;;  %p7981_p10 = scmp.lt.s32.totalorder %s7979_s20, %s7973_s15 }
 0x5ee   : > { %v5022_v21 = vcombine.high %v4996_v62, %v5004_v17  ;;  %v5038_v22 = vcombine.high %v5012_v18, %v5020_v19  ;;  %v5021_v23 = vcombine.low %v4996_v62, %v5004_v17  ;;  %v5037_v24 = vcombine.low %v5012_v18, %v5020_v19  ;;  %v5600_v62 = vld [vmem:[%s8936_s4] sm:$0xff]  ;;  %v5601_v17 = vld [vmem:[%s8936_s4 + $0x8] sm:$0xff]  ;;  %v5602_v18 = vld [vmem:[%s8936_s4 + $0x10] sm:$0xff] }
 0x5ef   : > { %v5615_v19 = vand.u32 4294901760, %v5600_v62  ;;  %v5618_v20 = vand.u32 4294901760, %v5601_v17  ;;  %p7975_p12 = pnand %p7974_p6, %p8949_p11  ;;  %p7982_p2 = por %p7981_p10, %p7980_p7 }
 0x5f0   : > { %v5036_v26 = vrot.slane %v5022_v21, %v8283_v6  ;;  %v5052_v27 = vrot.slane %v5038_v22, %v8283_v6  ;;  %v5029_v28 = vrot.slane %v5021_v23, %v8283_v6  ;;  %v5045_v32 = vrot.slane %v5037_v24, %v8283_v6  ;;  %v5603_v21 = vld [vmem:[%s8936_s4 + $0x18] sm:$0xff] }
 0x5f1   : > { %v7631_v6 = vpack.c.bf16 %v8616_v40, %v8614_v39  ;;  %v5621_v22 = vand.u32 4294901760, %v5602_v18  ;;  %v5624_v23 = vand.u32 4294901760, %v5603_v21  ;;  %v8708_v24 = vpack.c.bf16 %v5618_v20, %v5615_v19  ;;  %p7976_p13 = pneg %p7975_p12 }
 0x5f2   : > { %v5055_v61 = vcombine.low %v5036_v26, %v5052_v27  ;;  %v5054_v36 = vcombine.high %v5029_v28, %v5045_v32  ;;  %v5056_v37 = vcombine.high %v5036_v26, %v5052_v27  ;;  %v5053_v41 = vcombine.low %v5029_v28, %v5045_v32 }
 0x5f3   : > { %v5702_v26 = vsub.f32 %v5601_v17, %v5618_v20  ;;  %v5709_v27 = vsub.f32 %v5602_v18, %v5621_v22  ;;  %v5716_v28 = vsub.f32 %v5603_v21, %v5624_v23  ;;  %v8711_v32 = vpack.c.bf16 %v5624_v23, %v5621_v22  ;;  %v6106_v18 = vld [vmem:[%s8938_s6 + $0x30] sm:$0xff]  ;;  %p7983_p4 = pnand %p7982_p2, %p7976_p13 }
 0x5f4   : > { %5062 = vrot.lane.b32.xlu1 %v5055_v61, %s8052_s12  ;;  %5058 = vrot.lane.b32.xlu0 %v5054_v36, %s8053_s23  ;;  %v6135_v20 = vand.u32 4294901760, %v6106_v18 }
 0x5f5   : > { %v5703_v61 = vand.u32 4294901760, %v5702_v26 }
 0x5f8   : > { %5066 = vrot.lane.b32.xlu0 %v5056_v37, %s8054_s19  ;;  %v5704_v37 = vsub.f32 %v5702_v26, %v5703_v61  ;;  %s8887_s19 = scalar_lea.hbm %s8940_s8, %s6787_s26 }
 0x666   : > { %v5059_v43 = vpop.permute.xlu0 %5058  ;;  %v5063_v47 = vpop.permute.xlu1 %5062 }
 0x667   : > { %v5069_v52 = vsel %vm1272_vm2, %v5053_v41, %v5059_v43 }
 0x668   : > { %v5071_v53 = vsel %vm5070_vm3, %v5069_v52, %v5063_v47 }
 0x66a   : > { %v5067_v49 = vpop.permute.xlu0 %5066 }
 0x66b   : > { %v5073_v50 = vsel %vm5072_vm4, %v5071_v53, %v5067_v49 }
 0x66c   : > { %v5089_v51 = vsel %vm333_vm1, %v5073_v50, 0 }
 0x66d   : > { %v5160_v54 = vand.u32 4294901760, %v5089_v51 }
 0x66f   : > { %v5161_v57 = vsub.f32 %v5089_v51, %v5160_v54  ;;  %7356 = vmatmul.mubr.f32.vlgmr.msra.gmra.mrb[12].mxu1 %v5160_v54  ;;  %v7670_v51 = vpack.c.bf16 %v5716_v28, %v5709_v27 }
 0x670   : > { %7638 = vmatpush3.bf16.msra.mxu1 %v7619_v25  ;;  %7377 = vmatprep.mubr.msk.f32.mxu1 %vm8043_vm0, %v8044_v1 }
 0x671   : > { %7639 = vmatprep.subr.bf16.mxu1 %v8042_v0  ;;  %v5162_v39 = vand.u32 4294901760, %v5161_v57 }
 0x673   : > { %v5163_v40 = vsub.f32 %v5161_v57, %v5162_v39 }
 0x674   : > { %7641 = vmatpush3.bf16.msra.mxu1 %v7622_v33 }
 0x675   : > { %7648 = vmatprep.subr.bf16.mxu1 %v8042_v0  ;;  %v5164_v44 = vand.u32 4294901760, %v5163_v40  ;;  %v6101_v40 = vld [vmem:[%s8938_s6 + $0x8] sm:$0xff] }
 0x677   : > { %7378 = vmatmul.mubr.f32.vlgmr.msra.gmra.mrb[14].mxu1 %v5162_v39  ;;  %7345 = vmatmul.mubr.f32.vlgmr.msra.gmra.mrb[8].mxu0 %v5164_v44  ;;  %v6100_v39 = vld [vmem:[%s8938_s6] sm:$0xff] }
 0x678   : > { %7632 = vmatpush3.bf16.msra.mxu0 %v7631_v6  ;;  %7650 = vmatpush3.bf16.msra.mxu1 %v7619_v25  ;;  %v5695_v25 = vsub.f32 %v5600_v62, %v5615_v19  ;;  %v5705_v6 = vand.u32 4294901760, %v5704_v37  ;;  %v6117_v44 = vand.u32 4294901760, %v6100_v39  ;;  %v6107_v19 = vld [vmem:[%s8938_s6 + $0x38] sm:$0xff] }
 0x679   : > { %7633 = vmatprep.subr.bf16.mxu0 %v8042_v0  ;;  %7651 = vmatprep.subr.bf16.mxu1 %v8042_v0  ;;  %v6138_v21 = vand.u32 4294901760, %v6107_v19 }
 0x67a   : > { %7366 = vmatprep.mubr.msk.f32.mxu0 %vm8043_vm0, %v8044_v1  ;;  %7399 = vmatprep.mubr.msk.f32.mxu1 %vm8043_vm0, %v8044_v1  ;;  %v7667_v50 = vpack.c.bf16 %v5702_v26, %v5695_v25 }
 0x67b   : > { %v8798_v22 = vpack.c.bf16 %v6138_v21, %v6135_v20 }
 0x67c   : > { %7635 = vmatpush3.bf16.msra.mxu0 %v7634_v38  ;;  %7653 = vmatpush3.bf16.msra.mxu1 %v7622_v33  ;;  %v5696_v33 = vand.u32 4294901760, %v5695_v25  ;;  %v5710_v38 = vand.u32 4294901760, %v5709_v27 }
 0x67d   : > { %7642 = vmatprep.subr.bf16.mxu0 %v8042_v0  ;;  %7690 = vmatprep.subr.bf16.mxu1 %v8042_v0 }
 0x67e   : > { %v5697_v36 = vsub.f32 %v5695_v25, %v5696_v33  ;;  %v5711_v43 = vsub.f32 %v5709_v27, %v5710_v38  ;;  %v8808_v27 = vsub.f32 %v6106_v18, %v6135_v20 }
 0x67f   : > { %7367 = vmatmul.mubr.f32.vlgmr.msra.gmra.mrb[10].mxu0 %v5161_v57  ;;  %7400 = vmatmul.mubr.f32.vlgmr.msra.gmra.mrb[16].mxu1 %v5160_v54 }
 0x680   : > { %7644 = vmatpush3.bf16.msra.mxu0 %v7643_v46  ;;  %7388 = vmatprep.mubr.msk.f32.mxu0 %vm8043_vm0, %v8044_v1  ;;  %v5698_v41 = vand.u32 4294901760, %v5697_v36  ;;  %v5717_v46 = vand.u32 4294901760, %v5716_v28  ;;  %v5712_v52 = vand.u32 4294901760, %v5711_v43 }
 0x681   : > { %7645 = vmatprep.subr.bf16.mxu0 %v8042_v0  ;;  %7484 = vmatprep.mubr.msk.f32.mxu1 %vm8043_vm0, %v8044_v1 }
 0x682   : > { %v5718_v47 = vsub.f32 %v5716_v28, %v5717_v46  ;;  %v7682_v57 = vpack.c.bf16 %v5717_v46, %v5710_v38  ;;  %v8810_v28 = vsub.f32 %v6107_v19, %v6138_v21  ;;  %v6783_v19 = vld [vmem:[%s8939_s7 + $0x1] ss:$0 sm:$0xff] }
 0x684   : > { %7647 = vmatpush3.bf16.msra.mxu0 %v7646_v42  ;;  %v7661_v42 = vpack.c.bf16 %v5705_v6, %v5698_v41  ;;  %v5719_v49 = vand.u32 4294901760, %v5718_v47 }
 0x685   : > { %7654 = vmatprep.subr.bf16.mxu0 %v8042_v0 }
 0x686   : > { %v7664_v53 = vpack.c.bf16 %v5719_v49, %v5712_v52 }
 0x687   : > { %7389 = vmatmul.mubr.f32.vlgmr.msra.gmra.mrb[12].mxu0 %v5160_v54  ;;  %v7679_v54 = vpack.c.bf16 %v5703_v61, %v5696_v33 }
 0x688   : > { %7410 = vmatprep.mubr.msk.f32.mxu0 %vm8043_vm0, %v8044_v1  ;;  %7656 = vmatpush3.bf16.msra.mxu0 %v8708_v24 }
 0x689   : > { %7657 = vmatprep.subr.bf16.mxu0 %v8042_v0 }
 0x68c   : > { %7659 = vmatpush3.bf16.msra.mxu0 %v8711_v32 }
 0x68d   : > { %7660 = vmatprep.subr.bf16.mxu0 %v8042_v0 }
 0x742   : > { %v5257_v45 = vpop.f32.mrb[12].mxu1 }
 0x743   : > { %v7357_v55 = vpop.f32.mrb[13].mxu1 }
 0x74a   : > { %v5414_v34 = vpop.f32.mrb[14].mxu1  ;;  %v5166_v35 = vpop.f32.mrb[8].mxu0 }
 0x74b   : > { %v5167_v59 = vadd.f32 %v6779_v56, %v5166_v35  ;;  %v7379_v63 = vpop.f32.mrb[15].mxu1  ;;  %v7346_v2 = vpop.f32.mrb[9].mxu0  ;;  %v8724_v56 = vsub.f32 %v6100_v39, %v6117_v44 }
 0x74d   : > { %v5258_v3 = vadd.f32 %v5257_v45, %v5167_v59  ;;  %v6120_v45 = vand.u32 4294901760, %v6101_v40 }
 0x74f   : > { %v8722_v55 = vpack.c.bf16 %v6120_v45, %v6117_v44  ;;  %v6251_v44 = vand.u32 4294901760, %v8810_v28 }
 0x751   : > { %7692 = vmatpush3.bf16.msra.mxu1 %v8722_v55 }
 0x752   : > { %v5337_v4 = vpop.f32.mrb[10].mxu0  ;;  %v5572_v5 = vpop.f32.mrb[16].mxu1  ;;  %7693 = vmatprep.subr.bf16.mxu1 %v8042_v0 }
 0x753   : > { %v5338_v7 = vadd.f32 %v5337_v4, %v5258_v3  ;;  %v7368_v60 = vpop.f32.mrb[11].mxu0  ;;  %v7401_v8 = vpop.f32.mrb[17].mxu1  ;;  %v6780_v3 = vld [vmem:[%s8939_s7 + $0x2] ss:$0 sm:$0xff] }
 0x755   : > { %v5415_v58 = vadd.f32 %v5414_v34, %v5338_v7  ;;  %v8726_v34 = vsub.f32 %v6101_v40, %v6120_v45  ;;  %v6244_v40 = vand.u32 4294901760, %v8808_v27 }
 0x757   : > { %v6209_v33 = vand.u32 4294901760, %v8726_v34 }
 0x759   : > { %v6210_v36 = vsub.f32 %v8726_v34, %v6209_v33 }
 0x75a   : > { %v5497_v9 = vpop.f32.mrb[12].mxu0 }
 0x75b   : > { %v5498_v10 = vadd.f32 %v5497_v9, %v5415_v58  ;;  %v7390_v11 = vpop.f32.mrb[13].mxu0  ;;  %v6211_v41 = vand.u32 4294901760, %v6210_v36 }
 0x75d   : > { %v5573_v29 = vadd.f32 %v5572_v5, %v5498_v10  ;;  %v6781_v5 = vld [vmem:[%s8939_s7 + $0x3] ss:$0 sm:$0xff] }
 0x75f   : > { %v5576_v31 = vadd.f32 %v7942_v30, %v5573_v29  ;;  %v6102_v30 = vld [vmem:[%s8938_s6 + $0x10] sm:$0xff] }
 0x761   : > { %v5577_v12 = vsel %vm333_vm1, %v5576_v31, 0.0 }
 0x762   : > { %5578 = vadd.xlane.f32.xlu1 %v5577_v12  ;;  %v6123_v12 = vand.u32 4294901760, %v6102_v30 }
 0x764   : > { %v8800_v23 = vsub.f32 %v6102_v30, %v6123_v12 }
 0x766   : > { %v6216_v6 = vand.u32 4294901760, %v8800_v23 }
 0x7ef   : > { %v5579_v13 = vpop.xlane.xlu1 %5578 }
 0x7f0   : > { %v5580_v14 = vmul.f32 0.03125, %v5579_v13 }
 0x7f2   : > { %v5581_v15 = vsub.f32 %v5576_v31, %v5580_v14  ;;  %v6103_v31 = vld [vmem:[%s8938_s6 + $0x18] sm:$0xff] }
 0x7f3   : > { %v6126_v13 = vand.u32 4294901760, %v6103_v31 }
 0x7f4   : > { %v5582_v16 = vmul.f32 %v5581_v15, %v5581_v15 }
 0x7f5   : > { %v8774_v14 = vpack.c.bf16 %v6126_v13, %v6123_v12 }
 0x7f6   : > { %v5583_v48 = vsel %vm333_vm1, %v5582_v16, 0.0  ;;  %v6105_v16 = vld [vmem:[%s8938_s6 + $0x28] sm:$0xff] }
 0x7f7   : > { %5584 = vadd.xlane.f32.xlu0 %v5583_v48  ;;  %7695 = vmatpush3.bf16.msra.mxu1 %v8774_v14  ;;  %v6132_v62 = vand.u32 4294901760, %v6105_v16 }
 0x7f8   : > { %7696 = vmatprep.subr.bf16.mxu1 %v8042_v0 }
 0x7f9   : > { %v8806_v26 = vsub.f32 %v6105_v16, %v6132_v62 }
 0x884   : > { %v5585_v35 = vpop.xlane.xlu0 %5584 }
 0x885   : > { %v5586_v59 = vmul.f32 0.03125, %v5585_v35  ;;  %v6245_v35 = vsub.f32 %v8808_v27, %v6244_v40 }
 0x887   : > { %v5587_v63 = vadd.f32 1e-05, %v5586_v59  ;;  %v6252_v59 = vsub.f32 %v8810_v28, %v6251_v44 }
 0x889   : > { %7938 = vrsqrt.f32 %v5587_v63  ;;  %v6246_v63 = vand.u32 4294901760, %v6245_v35 }
 0x893   : > { %v7939_v2 = vpop.eup %7938 }
 0x894   : > { %v5589_v4 = vmul.f32 %v7939_v2, %v5581_v15  ;;  %v6104_v15 = vld [vmem:[%s8938_s6 + $0x20] sm:$0xff]  ;;  %v6253_v2 = vand.u32 4294901760, %v6252_v59 }
 0x895   : > { %v6129_v48 = vand.u32 4294901760, %v6104_v15 }
 0x896   : > { %v5594_v7 = vmul.f32 %v6780_v3, %v5589_v4  ;;  %v7712_v3 = vpack.c.bf16 %v6253_v2, %v6246_v63  ;;  %v7715_v4 = vpack.c.bf16 %v8726_v34, %v8724_v56 }
 0x897   : > { %v8786_v17 = vpack.c.bf16 %v6132_v62, %v6129_v48  ;;  %v8804_v25 = vsub.f32 %v6104_v15, %v6129_v48 }
 0x898   : > { %v8736_v60 = vadd.f32 %v6781_v5, %v5594_v7 }
 0x899   : > { %7698 = vmatpush3.bf16.msra.mxu1 %v8786_v17  ;;  %v6230_v49 = vand.u32 4294901760, %v8804_v25  ;;  %v7721_v7 = vpack.c.bf16 %v8806_v26, %v8804_v25 }
 0x89a   : > { %v5612_v8 = vsel %vm333_vm1, %v8736_v60, 0  ;;  %7699 = vmatprep.subr.bf16.mxu1 %v8042_v0 }
 0x89b   : > { %v5683_v58 = vand.u32 4294901760, %v5612_v8 }
 0x89d   : > { %v5684_v9 = vsub.f32 %v5612_v8, %v5683_v58  ;;  %7701 = vmatpush3.bf16.msra.mxu1 %v8798_v22  ;;  %v7724_v8 = vpack.c.bf16 %v8810_v28, %v8808_v27 }
 0x89e   : > { %7702 = vmatprep.subr.bf16.mxu1 %v8042_v0 }
 0x89f   : > { %v5685_v10 = vand.u32 4294901760, %v5684_v9 }
 0x8a1   : > { %v5686_v11 = vsub.f32 %v5684_v9, %v5685_v10 }
 0x8a3   : > { %v5687_v29 = vand.u32 4294901760, %v5686_v11  ;;  %v7748_v11 = vpack.c.bf16 %v6251_v44, %v6244_v40 }
 0x8a5   : > { %7411 = vmatmul.mubr.f32.vlgmr.msra.gmra.mrb[14].mxu0 %v5687_v29  ;;  %v6782_v29 = vld [vmem:[%s8937_s5] ss:$0 sm:$0xff] }
 0x8a6   : > { %7662 = vmatpush3.bf16.msra.mxu0 %v7661_v42  ;;  %7421 = vmatprep.mubr.msk.f32.mxu0 %vm8043_vm0, %v8044_v1  ;;  %v6217_v42 = vsub.f32 %v8800_v23, %v6216_v6 }
 0x8a7   : > { %7663 = vmatprep.subr.bf16.mxu0 %v8042_v0 }
 0x8a8   : > { %v6218_v47 = vand.u32 4294901760, %v6217_v42 }
 0x8aa   : > { %7665 = vmatpush3.bf16.msra.mxu0 %v7664_v53  ;;  %v6237_v53 = vand.u32 4294901760, %v8806_v26 }
 0x8ab   : > { %7666 = vmatprep.subr.bf16.mxu0 %v8042_v0 }
 0x8ad   : > { %7422 = vmatmul.mubr.f32.vlgmr.msra.gmra.mrb[14].mxu0 %v5683_v58 }
 0x8ae   : > { %7668 = vmatpush3.bf16.msra.mxu0 %v7667_v50  ;;  %7432 = vmatprep.mubr.msk.f32.mxu0 %vm8043_vm0, %v8044_v1 }
 0x8af   : > { %7669 = vmatprep.subr.bf16.mxu0 %v8042_v0 }
 0x8b2   : > { %7671 = vmatpush3.bf16.msra.mxu0 %v7670_v51  ;;  %v6231_v51 = vsub.f32 %v8804_v25, %v6230_v49 }
 0x8b3   : > { %7672 = vmatprep.subr.bf16.mxu0 %v8042_v0 }
 0x8b5   : > { %7433 = vmatmul.mubr.f32.vlgmr.msra.gmra.mrb[14].mxu0 %v5684_v9 }
 0x8b6   : > { %7674 = vmatpush3.bf16.msra.mxu0 %v8708_v24  ;;  %7443 = vmatprep.mubr.msk.f32.mxu0 %vm8043_vm0, %v8044_v1 }
 0x8b7   : > { %7675 = vmatprep.subr.bf16.mxu0 %v8042_v0 }
 0x8ba   : > { %7677 = vmatpush3.bf16.msra.mxu0 %v8711_v32 }
 0x8bb   : > { %7678 = vmatprep.subr.bf16.mxu0 %v8042_v0 }
 0x8bd   : > { %7444 = vmatmul.mubr.f32.vlgmr.msra.gmra.mrb[14].mxu0 %v5685_v10  ;;  %v7745_v10 = vpack.c.bf16 %v6237_v53, %v6230_v49 }
 0x8be   : > { %7680 = vmatpush3.bf16.msra.mxu0 %v7679_v54  ;;  %7454 = vmatprep.mubr.msk.f32.mxu0 %vm8043_vm0, %v8044_v1  ;;  %v6238_v54 = vsub.f32 %v8806_v26, %v6237_v53 }
 0x8bf   : > { %7681 = vmatprep.subr.bf16.mxu0 %v8042_v0 }
 0x8c0   : > { %v6239_v39 = vand.u32 4294901760, %v6238_v54 }
 0x8c2   : > { %7683 = vmatpush3.bf16.msra.mxu0 %v7682_v57  ;;  %v6232_v57 = vand.u32 4294901760, %v6231_v51 }
 0x8c3   : > { %7684 = vmatprep.subr.bf16.mxu0 %v8042_v0 }
 0x8c4   : > { %v7709_v45 = vpack.c.bf16 %v6239_v39, %v6232_v57 }
 0x8c5   : > { %7455 = vmatmul.mubr.f32.vlgmr.msra.gmra.mrb[14].mxu0 %v5683_v58 }
 0x8c6   : > { %7686 = vmatpush3.bf16.msra.mxu0 %v8708_v24  ;;  %7465 = vmatprep.mubr.msk.f32.mxu0 %vm8043_vm0, %v8044_v1  ;;  %v8802_v24 = vsub.f32 %v6103_v31, %v6126_v13 }
 0x8c7   : > { %7687 = vmatprep.subr.bf16.mxu0 %v8042_v0 }
 0x8c8   : > { %v6223_v38 = vand.u32 4294901760, %v8802_v24  ;;  %v7718_v5 = vpack.c.bf16 %v8802_v24, %v8800_v23 }
 0x8ca   : > { %7689 = vmatpush3.bf16.msra.mxu0 %v8711_v32  ;;  %v6202_v32 = vand.u32 4294901760, %v8724_v56  ;;  %v6224_v43 = vsub.f32 %v8802_v24, %v6223_v38  ;;  %v7742_v9 = vpack.c.bf16 %v6223_v38, %v6216_v6 }
 0x8cb   : > { %7726 = vmatprep.subr.bf16.mxu0 %v8042_v0 }
 0x8cc   : > { %v6203_v61 = vsub.f32 %v8724_v56, %v6202_v32  ;;  %v6225_v52 = vand.u32 4294901760, %v6224_v43 }
 0x8cd   : > { %7466 = vmatmul.mubr.f32.vlgmr.msra.gmra.mrb[14].mxu0 %v5683_v58  ;;  %v7739_v58 = vpack.c.bf16 %v6209_v33, %v6202_v32 }
 0x8ce   : > { %7728 = vmatpush3.bf16.msra.mxu0 %v8722_v55  ;;  %7541 = vmatprep.mubr.msk.f32.mxu0 %vm8043_vm0, %v8044_v1  ;;  %v6204_v37 = vand.u32 4294901760, %v6203_v61  ;;  %v7706_v50 = vpack.c.bf16 %v6225_v52, %v6218_v47 }
 0x8cf   : > { %7729 = vmatprep.subr.bf16.mxu0 %v8042_v0 }
 0x8d0   : > { %v7703_v46 = vpack.c.bf16 %v6211_v41, %v6204_v37 }
 0x8d2   : > { %7731 = vmatpush3.bf16.msra.mxu0 %v8774_v14 }
 0x8d3   : > { %7732 = vmatprep.subr.bf16.mxu0 %v8042_v0 }
 0x8d6   : > { %7734 = vmatpush3.bf16.msra.mxu0 %v8786_v17 }
 0x8d7   : > { %7735 = vmatprep.subr.bf16.mxu0 %v8042_v0 }
 0x8da   : > { %7737 = vmatpush3.bf16.msra.mxu0 %v8798_v22 }
 0x8db   : > { %7750 = vmatprep.subr.bf16.mxu0 %v8042_v0 }
 0x9a0   : > { %v6095_v30 = vpop.f32.mrb[14].mxu0 }
 0x9a1   : > { %v7764_v31 = vadd.f32 %v6782_v29, %v6095_v30  ;;  %v7467_v56 = vpop.f32.mrb[15].mxu0 }
 0x9a3   : > { %v6099_v34 = vmax.f32 %v7764_v31, 0.0 }
 0x9a5   : > { %v6114_v12 = vsel %vm6112_vm5, %v6099_v34, 0 }
 0x9a6   : > { %v6189_v13 = vand.u32 4294901760, %v6114_v12 }
 0x9a8   : > { %v6190_v15 = vsub.f32 %v6114_v12, %v6189_v13 }
 0x9aa   : > { %v6191_v16 = vand.u32 4294901760, %v6190_v15 }
 0x9ac   : > { %7542 = vmatmul.mubr.f32.vlgmr.msra.gmra.mrb[16].mxu0 %v6191_v16  ;;  %v6192_v48 = vsub.f32 %v6190_v15, %v6191_v16 }
 0x9ad   : > { %7752 = vmatpush3.bf16.msra.mxu0 %v8722_v55  ;;  %7579 = vmatprep.mubr.msk.f32.mxu0 %vm8043_vm0, %v8044_v1 }
 0x9ae   : > { %7753 = vmatprep.subr.bf16.mxu0 %v8042_v0  ;;  %v6193_v62 = vand.u32 4294901760, %v6192_v48 }
 0x9b0   : > { %7485 = vmatmul.mubr.f32.vlgmr.msra.gmra.mrb[18].mxu1 %v6193_v62 }
 0x9b1   : > { %7704 = vmatpush3.bf16.msra.mxu1 %v7703_v46  ;;  %7755 = vmatpush3.bf16.msra.mxu0 %v8774_v14 }
 0x9b2   : > { %7705 = vmatprep.subr.bf16.mxu1 %v8042_v0  ;;  %7756 = vmatprep.subr.bf16.mxu0 %v8042_v0 }
 0x9b3   : > { %7503 = vmatprep.mubr.msk.f32.mxu1 %vm8043_vm0, %v8044_v1 }
 0x9b5   : > { %7707 = vmatpush3.bf16.msra.mxu1 %v7706_v50  ;;  %7758 = vmatpush3.bf16.msra.mxu0 %v8786_v17  ;;  %v6785_v50 = vld [vmem:[%s8939_s7 + $0x5] ss:$0 sm:$0xff] }
 0x9b6   : > { %7708 = vmatprep.subr.bf16.mxu1 %v8042_v0  ;;  %7759 = vmatprep.subr.bf16.mxu0 %v8042_v0 }
 0x9b9   : > { %7710 = vmatpush3.bf16.msra.mxu1 %v7709_v45  ;;  %7761 = vmatpush3.bf16.msra.mxu0 %v8798_v22 }
 0x9ba   : > { %7711 = vmatprep.subr.bf16.mxu1 %v8042_v0 }
 0x9bc   : > { %7580 = vmatmul.mubr.f32.vlgmr.msra.gmra.mrb[18].mxu0 %v6189_v13 }
 0x9bd   : > { %7713 = vmatpush3.bf16.msra.mxu1 %v7712_v3 }
 0x9be   : > { %7714 = vmatprep.subr.bf16.mxu1 %v8042_v0 }
 0x9c0   : > { %7504 = vmatmul.mubr.f32.vlgmr.msra.gmra.mrb[20].mxu1 %v6189_v13 }
 0x9c1   : > { %7716 = vmatpush3.bf16.msra.mxu1 %v7715_v4  ;;  %7522 = vmatprep.mubr.msk.f32.mxu1 %vm8043_vm0, %v8044_v1 }
 0x9c2   : > { %7717 = vmatprep.subr.bf16.mxu1 %v8042_v0 }
 0x9c5   : > { %7719 = vmatpush3.bf16.msra.mxu1 %v7718_v5 }
 0x9c6   : > { %7720 = vmatprep.subr.bf16.mxu1 %v8042_v0 }
 0x9c9   : > { %7722 = vmatpush3.bf16.msra.mxu1 %v7721_v7 }
 0x9ca   : > { %7723 = vmatprep.subr.bf16.mxu1 %v8042_v0 }
 0x9cd   : > { %7725 = vmatpush3.bf16.msra.mxu1 %v7724_v8 }
 0x9ce   : > { %7738 = vmatprep.subr.bf16.mxu1 %v8042_v0 }
 0x9d0   : > { %7523 = vmatmul.mubr.f32.vlgmr.msra.gmra.mrb[22].mxu1 %v6190_v15 }
 0x9d1   : > { %7740 = vmatpush3.bf16.msra.mxu1 %v7739_v58  ;;  %7560 = vmatprep.mubr.msk.f32.mxu1 %vm8043_vm0, %v8044_v1 }
 0x9d2   : > { %7741 = vmatprep.subr.bf16.mxu1 %v8042_v0 }
 0x9d5   : > { %7743 = vmatpush3.bf16.msra.mxu1 %v7742_v9 }
 0x9d6   : > { %7744 = vmatprep.subr.bf16.mxu1 %v8042_v0 }
 0x9d9   : > { %7746 = vmatpush3.bf16.msra.mxu1 %v7745_v10 }
 0x9da   : > { %7747 = vmatprep.subr.bf16.mxu1 %v8042_v0 }
 0x9dd   : > { %7749 = vmatpush3.bf16.msra.mxu1 %v7748_v11 }
 0x9e0   : > { %7561 = vmatmul.mubr.f32.vlgmr.msra.gmra.mrb[24].mxu1 %v6189_v13 }
 0xa7f   : > { %v6475_v55 = vpop.f32.mrb[16].mxu0 }
 0xa80   : > { %v7543_v14 = vpop.f32.mrb[17].mxu0 }
 0xa83   : > { %v6195_v17 = vpop.f32.mrb[18].mxu1 }
 0xa84   : > { %v7486_v18 = vpop.f32.mrb[19].mxu1  ;;  %v6196_v21 = vadd.f32 %v6783_v19, %v6195_v17 }
 0xa8f   : > { %v6649_v20 = vpop.f32.mrb[18].mxu0 }
 0xa90   : > { %v7581_v1 = vpop.f32.mrb[19].mxu0 }
 0xa93   : > { %v6306_v22 = vpop.f32.mrb[20].mxu1 }
 0xa94   : > { %v6307_v23 = vadd.f32 %v6306_v22, %v6196_v21  ;;  %v7505_v24 = vpop.f32.mrb[21].mxu1 }
 0xaa3   : > { %v6394_v25 = vpop.f32.mrb[22].mxu1 }
 0xaa4   : > { %v6395_v26 = vadd.f32 %v6394_v25, %v6307_v23  ;;  %v7524_v27 = vpop.f32.mrb[23].mxu1 }
 0xaa6   : > { %v6476_v0 = vadd.f32 %v6475_v55, %v6395_v26 }
 0xab3   : > { %v6570_v28 = vpop.f32.mrb[24].mxu1 }
 0xab4   : > { %v6571_v32 = vadd.f32 %v6570_v28, %v6476_v0  ;;  %v7562_v33 = vpop.f32.mrb[25].mxu1 }
 0xab6   : > { %v6650_v61 = vadd.f32 %v6649_v20, %v6571_v32 }
 0xab8   : > { %v6653_v36 = vadd.f32 %v6650_v61, %v8736_v60  ;;  %v6784_v60 = vld [vmem:[%s8939_s7 + $0x4] ss:$0 sm:$0xff] }
 0xaba   : > { %v6654_v37 = vsel %vm333_vm1, %v6653_v36, 0.0 }
 0xabb   : > { %6655 = vadd.xlane.f32.xlu0 %v6654_v37 }
 0xb48   : > { %v6656_v41 = vpop.xlane.xlu0 %6655 }
 0xb49   : > { %v6657_v6 = vmul.f32 0.03125, %v6656_v41 }
 0xb4b   : > { %v6658_v38 = vsub.f32 %v6653_v36, %v6657_v6 }
 0xb4d   : > { %v6659_v46 = vmul.f32 %v6658_v38, %v6658_v38 }
 0xb4f   : > { %v6660_v42 = vsel %vm333_vm1, %v6659_v46, 0.0 }
 0xb50   : > { %6661 = vadd.xlane.f32.xlu1 %v6660_v42 }
 0xbdd   : > { %v6662_v43 = vpop.xlane.xlu1 %6661 }
 0xbde   : > { %v6663_v47 = vmul.f32 0.03125, %v6662_v43 }
 0xbe0   : > { %v6664_v52 = vadd.f32 1e-05, %v6663_v47 }
 0xbe2   : > { %7940 = vrsqrt.f32 %v6664_v52 }
 0xbec   : > { %v7941_v49 = vpop.eup %7940 }
 0xbed   : > { %v6666_v53 = vmul.f32 %v7941_v49, %v6658_v38 }
 0xbef   : > { %v6671_v51 = vmul.f32 %v6784_v60, %v6666_v53 }
 0xbf1   : > { %v6676_v54 = vadd.f32 %v6785_v50, %v6671_v51 }
 0xbf3   : > { %6677 = vst.msk [vmem:[%s320_s10] sm:$0xff] %vm333_vm1, %v6676_v54 }
 0xbf4   : > { %7986 = shalt.err (!%p7983_p4)
}
 0xbf5   : > { %s7987_s13 = scalar_lea.hbm %s8887_s19, 128  ;;  %s7991_s26 = scalar_lea.hbm %s8940_s8, 256 }
 0xbf6   : > { %p7988_p5 = scmp.ne.s32.totalorder %s8887_s19, %s7987_s13  ;;  %p7992_p0 = scmp.lt.u32.totalorder %s8887_s19, %s8940_s8 }
 0xbf7   : > { %p7993_p1 = scmp.lt.u32.totalorder %s7991_s26, %s7987_s13  ;;  %p7995_p6 = scmp.lt.u32.totalorder %s7987_s13, %s8887_s19 }
 0xbf8   : > { %p7989_p8 = pnand %p7988_p5, %p8949_p11 }
 0xbf9   : > { %p7994_p3 = por %p7993_p1, %p7992_p0 }
 0xbfa   : > { %p7990_p9 = pneg %p7989_p8 }
 0xbfb   : > { %p7996_p12 = por %p7995_p6, %p7994_p3 }
 0xbfd   : > { %p7997_p13 = pnand %p7996_p12, %p7990_p9 }
 0xbff   : > { %8000 = shalt.err (!%p7997_p13)
}
 0xc00   : > { %7865 = dma.vmem_to_hbm [thread:$0]  (%p8949_p11), %s8889_s16, 128, %s8887_s19, %s6679_s25  }
 0xc01 PF: > { %s6704_s23 = sand.u32 1, %s8027_s27   ;;  %p8950_p7 = scmp.ne.s32.totalorder %s8945_s18, 0 }
 0xc02   : > { %p8951_p10 = scmp.ge.s32.totalorder %s8039_s30, 2  ;;  %s6705_s15 = scalar_lea.sflag [#allocation4], %s6704_s23 }
 0xc04   : > { %p7872_p2 = pnand %p8951_p10, %p8950_p7 }
 0xc06   : > { %8022 = dma.done.wait (!%p7872_p2), %s6705_s15, 128  }
 0xc07   : > { %8024 = vsyncadd (!%p7872_p2), %s6705_s15, 4294967168  ;;  %p21_p4 = scmp.ge.s32.totalorder %s8126_s11, 4   ;;  %s8952_s27 = smov %s8031_s28 }
 0xc08   : > { %s8953_s28 = smov %s8035_s29  ;;  %s8954_s29 = smov %s8138_s14 }
 0xc09   : > { %s8955_s30 = smov %s8126_s11  ;;  %23 = sbr.rel (!%p21_p4) target bundleno = 5 (0x5), region = 97 }
 0xc10   :  { %6710 = vsyncpa [#allocation3], 1 }
 0xc11   :  { %6712 = vsyncpa [#allocation3 + $0x1], 1 }
 0xc12   :  { %6713 = vsyncpa [#allocation4], 1 }
 0xc13   :  { %6715 = vsyncpa [#allocation4 + $0x1], 1 }

</bundles_post_ra>
